<compile_context>
chip_gen: v6e
topology: v6e:2x2x1
jax: 0.10.0
libtpu: 0.0.40
codegen_flags: <defaults>
</compile_context>

<pallas_src>
import functools

import jax
import jax.numpy as jnp
from jax.experimental import pallas as pl
from jax.experimental.pallas import tpu as pltpu

LANE = 128  # w2/b2 zero-padded to one full lane group so layer 2 is lane-dense


def qnetwork_kernel(x_ref, w1_ref, b1_ref, w2_ref, b2_ref, out_ref):
    x = x_ref[...]                                     # [TB, 4]  f32
    w1 = w1_ref[...]                                   # [4, H]   f32
    # ---- Layer 1 on the VPU: K=4 contraction as 4 broadcast FMAs, bias folded in.
    h = b1_ref[...] + x[:, 0:1] * w1[0:1, :]           # [TB, H]  f32
    for k in range(1, w1.shape[0]):                    # static unroll (K=4)
        h = h + x[:, k:k + 1] * w1[k:k + 1, :]
    h = jnp.maximum(h, 0.0)                            # ReLU in f32 (v5e-safe)
    # ---- Layer 2 on the MXU: f32 operands, f32 accumulate, lane-dense N=128.
    o = jnp.dot(h, w2_ref[...], preferred_element_type=jnp.float32)   # [TB, 128]
    o = o + b2_ref[...]
    # ---- Store only the real Q-value columns: unpadded (TB, num_out) writeback.
    # (A consumer-fused greedy-argmax variant would emit (TB, 1) int32 here.)
    out_ref[...] = o[:, :out_ref.shape[1]]


def prepare_params(w1, b1, w2, b2):
    """One-time layout prep (do NOT redo this per forward call)."""
    k_in, hidden = w1.shape
    hidden2, num_out = w2.shape
    assert hidden == hidden2
    # Kernel assumes lane-dense hidden activations / weights.
    assert hidden % LANE == 0, "num_hidden must be a multiple of 128 (pad it here otherwise)"
    w2_p = jnp.zeros((hidden, LANE), jnp.float32).at[:, :num_out].set(w2.astype(jnp.float32))
    b2_p = jnp.zeros((1, LANE), jnp.float32).at[:, :num_out].set(b2.astype(jnp.float32))
    return (w1.astype(jnp.float32),
            b1.reshape(1, -1).astype(jnp.float32),
            w2_p, b2_p, num_out)


_SINGLE_TC_KINDS = ("v5e", "v5 lite", "v6e", "v6 lite")


def pick_batch_tile(batch):
    """Grid-collapse policy: 1 tile on single-TC chips (v5e/v6e); 2 tiles on
    multi-TC chips (v7x / megacore) so the 'parallel' grid axis feeds both cores."""
    kind = ""
    try:
        kind = jax.devices()[0].device_kind.lower()
    except Exception:
        pass
    single_tc = any(t in kind for t in _SINGLE_TC_KINDS)
    if (not single_tc) and batch % 2 == 0 and (batch // 2) % 8 == 0:
        return batch // 2          # grid=(2,): one tile per TensorCore
    return batch                   # grid=(1,): zero per-step grid overhead


@functools.partial(jax.jit, static_argnames=("num_out", "tb"))
def qnetwork_forward(x, w1, b1_2d, w2_p, b2_p, *, num_out=2, tb=None):
    B, K = x.shape
    H = w1.shape[1]
    N = w2_p.shape[1]
    if tb is None:
        tb = pick_batch_tile(B)
    assert B % tb == 0 and (tb == B or tb % 8 == 0), "batch tile must divide B and be sublane-aligned"
    flops = 2 * B * H * (K + N)
    bytes_accessed = 4 * (x.size + w1.size + b1_2d.size + w2_p.size + b2_p.size + B * num_out)
    return pl.pallas_call(
        qnetwork_kernel,
        out_shape=jax.ShapeDtypeStruct((B, num_out), jnp.float32),
        grid=(B // tb,),
        in_specs=[
            pl.BlockSpec((tb, K), lambda i: (i, 0)),   # x: tiled over batch
            pl.BlockSpec((K, H), lambda i: (0, 0)),    # w1: VMEM-resident
            pl.BlockSpec((1, H), lambda i: (0, 0)),    # b1: VMEM-resident
            pl.BlockSpec((H, N), lambda i: (0, 0)),    # w2 (lane-padded, f32)
            pl.BlockSpec((1, N), lambda i: (0, 0)),    # b2 (lane-padded, f32)
        ],
        out_specs=pl.BlockSpec((tb, num_out), lambda i: (i, 0)),   # unpadded writeback
        compiler_params=pltpu.CompilerParams(
            dimension_semantics=("parallel",)),        # shards grid across TCs on v7x
        cost_estimate=pl.CostEstimate(
            flops=flops, transcendentals=0, bytes_accessed=bytes_accessed),
    )(x, w1, b1_2d, w2_p, b2_p)


def init_params(key, num_hidden=128):
    # Deterministic synthetic init mimicking nn.Linear's U(-1/sqrt(fan_in), +)
    k1, k2, k3, k4 = jax.random.split(key, 4)
    bound1 = 1.0 / jnp.sqrt(4.0)
    bound2 = 1.0 / jnp.sqrt(float(num_hidden))
    w1 = jax.random.uniform(k1, (4, num_hidden), jnp.float32, -bound1, bound1)
    b1 = jax.random.uniform(k2, (num_hidden,), jnp.float32, -bound1, bound1)
    w2 = jax.random.uniform(k3, (num_hidden, 2), jnp.float32, -bound2, bound2)
    b2 = jax.random.uniform(k4, (2,), jnp.float32, -bound2, bound2)
    return w1, b1, w2, b2


if __name__ == "__main__":
    key = jax.random.PRNGKey(0)
    kx, kp = jax.random.split(key)
    B, H = 1024, 128                       # CartPole-style state batch; module default hidden
    x = jax.random.normal(kx, (B, 4), jnp.float32)
    w1, b1, w2, b2 = init_params(kp, num_hidden=H)
    w1p, b1p, w2p, b2p, num_out = prepare_params(w1, b1, w2, b2)

    out = qnetwork_forward(x, w1p, b1p, w2p, b2p, num_out=num_out)
    out = jax.block_until_ready(out)
    assert out.shape == (B, num_out)

    # Full-f32 reference (the kernel now runs layer 2 with f32 MXU operands too).
    h_ref = jnp.maximum(jnp.dot(x, w1, precision=jax.lax.Precision.HIGHEST) + b1, 0.0)
    ref = jnp.dot(h_ref, w2, precision=jax.lax.Precision.HIGHEST) + b2
    assert jnp.allclose(out, ref, atol=5e-3, rtol=5e-3), "mismatch vs f32 reference"
    print("KERNEL_OK")
</pallas_src>

<mosaic_0001>
module attributes {stable_mosaic.version = 11 : i64} {
  func.func @qnetwork_kernel(%arg0: i32, %arg1: memref<512x4xf32, #tpu.memory_space<vmem>>, %arg2: memref<4x128xf32, #tpu.memory_space<vmem>>, %arg3: memref<1x128xf32, #tpu.memory_space<vmem>>, %arg4: memref<128x128xf32, #tpu.memory_space<vmem>>, %arg5: memref<1x128xf32, #tpu.memory_space<vmem>>, %arg6: memref<512x2xf32, #tpu.memory_space<vmem>>) attributes {dimension_semantics = [#tpu.dimension_semantics<parallel>], iteration_bounds = array<i64: 2>, scalar_prefetch = 0 : i64, scratch_operands = 0 : i64, tpu.core_type = #tpu.core_type<tc>, window_params = [{transform_indices = @transform_0, window_bounds = array<i64: 512, 4>}, {pipeline_mode = #tpu.pipeline_mode<synchronous>, transform_indices = @transform_1, window_bounds = array<i64: 4, 128>}, {pipeline_mode = #tpu.pipeline_mode<synchronous>, transform_indices = @transform_2, window_bounds = array<i64: 1, 128>}, {pipeline_mode = #tpu.pipeline_mode<synchronous>, transform_indices = @transform_3, window_bounds = array<i64: 128, 128>}, {pipeline_mode = #tpu.pipeline_mode<synchronous>, transform_indices = @transform_4, window_bounds = array<i64: 1, 128>}, {transform_indices = @transform_5, window_bounds = array<i64: 512, 2>}]} {
    %c0 = arith.constant 0 : index
    %c0_0 = arith.constant 0 : index
    %0 = vector.load %arg1[%c0, %c0_0] : memref<512x4xf32, #tpu.memory_space<vmem>>, vector<512x4xf32>
    %c0_1 = arith.constant 0 : index
    %c0_2 = arith.constant 0 : index
    %1 = vector.load %arg2[%c0_1, %c0_2] : memref<4x128xf32, #tpu.memory_space<vmem>>, vector<4x128xf32>
    %c0_3 = arith.constant 0 : index
    %c0_4 = arith.constant 0 : index
    %2 = vector.load %arg3[%c0_3, %c0_4] : memref<1x128xf32, #tpu.memory_space<vmem>>, vector<1x128xf32>
    %3 = vector.extract_strided_slice %0 {offsets = [0, 0], sizes = [512, 1], strides = [1, 1]} : vector<512x4xf32> to vector<512x1xf32>
    %4 = vector.extract_strided_slice %1 {offsets = [0, 0], sizes = [1, 128], strides = [1, 1]} : vector<4x128xf32> to vector<1x128xf32>
    %5 = vector.broadcast %3 : vector<512x1xf32> to vector<512x128xf32>
    %6 = vector.broadcast %4 : vector<1x128xf32> to vector<512x128xf32>
    %7 = arith.mulf %5, %6 : vector<512x128xf32>
    %8 = vector.broadcast %2 : vector<1x128xf32> to vector<512x128xf32>
    %9 = arith.addf %8, %7 : vector<512x128xf32>
    %10 = vector.extract_strided_slice %0 {offsets = [0, 1], sizes = [512, 1], strides = [1, 1]} : vector<512x4xf32> to vector<512x1xf32>
    %11 = vector.extract_strided_slice %1 {offsets = [1, 0], sizes = [1, 128], strides = [1, 1]} : vector<4x128xf32> to vector<1x128xf32>
    %12 = vector.broadcast %10 : vector<512x1xf32> to vector<512x128xf32>
    %13 = vector.broadcast %11 : vector<1x128xf32> to vector<512x128xf32>
    %14 = arith.mulf %12, %13 : vector<512x128xf32>
    %15 = arith.addf %9, %14 : vector<512x128xf32>
    %16 = vector.extract_strided_slice %0 {offsets = [0, 2], sizes = [512, 1], strides = [1, 1]} : vector<512x4xf32> to vector<512x1xf32>
    %17 = vector.extract_strided_slice %1 {offsets = [2, 0], sizes = [1, 128], strides = [1, 1]} : vector<4x128xf32> to vector<1x128xf32>
    %18 = vector.broadcast %16 : vector<512x1xf32> to vector<512x128xf32>
    %19 = vector.broadcast %17 : vector<1x128xf32> to vector<512x128xf32>
    %20 = arith.mulf %18, %19 : vector<512x128xf32>
    %21 = arith.addf %15, %20 : vector<512x128xf32>
    %22 = vector.extract_strided_slice %0 {offsets = [0, 3], sizes = [512, 1], strides = [1, 1]} : vector<512x4xf32> to vector<512x1xf32>
    %23 = vector.extract_strided_slice %1 {offsets = [3, 0], sizes = [1, 128], strides = [1, 1]} : vector<4x128xf32> to vector<1x128xf32>
    %24 = vector.broadcast %22 : vector<512x1xf32> to vector<512x128xf32>
    %25 = vector.broadcast %23 : vector<1x128xf32> to vector<512x128xf32>
    %26 = arith.mulf %24, %25 : vector<512x128xf32>
    %27 = arith.addf %21, %26 : vector<512x128xf32>
    %cst = arith.constant 0.000000e+00 : f32
    %28 = vector.broadcast %cst : f32 to vector<512x128xf32>
    %29 = arith.maximumf %27, %28 : vector<512x128xf32>
    %c0_5 = arith.constant 0 : index
    %c0_6 = arith.constant 0 : index
    %30 = vector.load %arg4[%c0_5, %c0_6] : memref<128x128xf32, #tpu.memory_space<vmem>>, vector<128x128xf32>
    %cst_7 = arith.constant dense<0.000000e+00> : vector<512x128xf32>
    %31 = tpu.matmul %29, %30, %cst_7 {dimension_numbers = #tpu.dot_dimension_numbers<[1], [0], [0], [1], [0, 0, 1, 1], [], []>} : vector<512x128xf32>, vector<128x128xf32>, vector<512x128xf32> -> vector<512x128xf32>
    %c0_8 = arith.constant 0 : index
    %c0_9 = arith.constant 0 : index
    %32 = vector.load %arg5[%c0_8, %c0_9] : memref<1x128xf32, #tpu.memory_space<vmem>>, vector<1x128xf32>
    %33 = vector.broadcast %32 : vector<1x128xf32> to vector<512x128xf32>
    %34 = arith.addf %31, %33 : vector<512x128xf32>
    %35 = vector.extract_strided_slice %34 {offsets = [0, 0], sizes = [512, 2], strides = [1, 1]} : vector<512x128xf32> to vector<512x2xf32>
    %c0_10 = arith.constant 0 : index
    %c0_11 = arith.constant 0 : index
    %36 = vector.load %arg6[%c0_10, %c0_11] : memref<512x2xf32, #tpu.memory_space<vmem>>, vector<512x2xf32>
    tpu.vector_store %arg6[%c0_10, %c0_11], %35 {strides = array<i32>} : memref<512x2xf32, #tpu.memory_space<vmem>>, vector<512x2xf32>,
    return
  }
  func.func @transform_0(%arg0: i32) -> (i32, i32) {
    %c0_i32 = arith.constant 0 : i32
    %c0_i32_0 = arith.constant 0 : i32
    return %arg0, %c0_i32 : i32, i32
  }
  func.func @transform_1(%arg0: i32) -> (i32, i32) {
    %c0_i32 = arith.constant 0 : i32
    %c0_i32_0 = arith.constant 0 : i32
    %c0_i32_1 = arith.constant 0 : i32
    return %c0_i32, %c0_i32_0 : i32, i32
  }
  func.func @transform_2(%arg0: i32) -> (i32, i32) {
    %c0_i32 = arith.constant 0 : i32
    %c0_i32_0 = arith.constant 0 : i32
    %c0_i32_1 = arith.constant 0 : i32
    return %c0_i32, %c0_i32_0 : i32, i32
  }
  func.func @transform_3(%arg0: i32) -> (i32, i32) {
    %c0_i32 = arith.constant 0 : i32
    %c0_i32_0 = arith.constant 0 : i32
    %c0_i32_1 = arith.constant 0 : i32
    return %c0_i32, %c0_i32_0 : i32, i32
  }
  func.func @transform_4(%arg0: i32) -> (i32, i32) {
    %c0_i32 = arith.constant 0 : i32
    %c0_i32_0 = arith.constant 0 : i32
    %c0_i32_1 = arith.constant 0 : i32
    return %c0_i32, %c0_i32_0 : i32, i32
  }
  func.func @transform_5(%arg0: i32) -> (i32, i32) {
    %c0_i32 = arith.constant 0 : i32
    %c0_i32_0 = arith.constant 0 : i32
    return %arg0, %c0_i32 : i32, i32
  }
}

</mosaic_0001>

<bundles_post_ra>
// kernel: qnetwork_forward.1
= control target key start
LH: loop header
LB: loop body
LE: loop exit
PB: predicated region body
PF: predicated region fallthrough
CT: control target
= control target key end

     0   :  { %s2858_s18 = smov 0   ;;  %s4560_s0 = inlined_call_operand.vmem [shape: f32[1024,4], index: 0, kind: input, shape index: {}]   ;;  %s4561_s1 = inlined_call_operand.vmem [shape: f32[4,128], index: 1, kind: input, shape index: {}]   ;;  %s4562_s2 = inlined_call_operand.vmem [shape: f32[1,128], index: 2, kind: input, shape index: {}]   ;;  %s4563_s3 = inlined_call_operand.vmem [shape: f32[128,128], index: 3, kind: input, shape index: {}]   ;;  %s4564_s4 = inlined_call_operand.vmem [shape: f32[1,128], index: 4, kind: input, shape index: {}]   ;;  %s4565_s5 = inlined_call_operand.vmem [shape: f32[1024,2], index: 5, kind: output, shape index: {}]  }
   0x1 LB: > { %s2509_s19 = sadd.s32 4294967295, %s2822_s18   ;;  %p2513_p0 = scmp.ge.s32.totalorder %s2822_s18, 1  ;;  %s2822_s18 = sphi %s2858_s18, %s15_s18  }
   0x2   : > { %p188_p1 = scmp.lt.s32.totalorder %s2822_s18, 3 }
   0x4   : > { %p189_p2 = pnand %p2513_p0, %p188_p1 }
   0x6   : > { %192 = sbr.rel (%p189_p2) target bundleno = 913 (0x391), region = 40 }
   0xb   : > { %s2514_s20 = sshll.u32 %s2509_s19, 6  ;;  %v2824_v0 = vmov 0   ;;  %vm2388_vm0 = vcmask 15360  }
   0xc   : > { %2775 = vset.pattern.permute.xlu1 %v2824_v0  ;;  %2774 = vset.pattern.permute.xlu0 %v2824_v0  ;;  %p217_p3 = scmp.lt.s32.totalorder %s2514_s20, 127 }
   0xe   : > { %s4950_s20 = smov (!%p217_p3, %s2514_s20), 127 }
   0xf   : > { %s2515_s21 = sshll.u32 %s4950_s20, 3 }
  0x10   : > { %s2874_s24 = scalar_lea.vmem %s4560_s0, %s2515_s21  ;;  %s4351_s23 = scalar_lea.vmem %s4565_s5, %s2515_s21 }
  0x11   : > { %v2877_v1 = vld [vmem:[%s2874_s24 + $0x10] sm:$0xff]  ;;  %v2880_v2 = vld [vmem:[%s2874_s24] sm:$0xff]  ;;  %v2885_v3 = vld [vmem:[%s2874_s24 + $0x18] sm:$0xff] }
  0x12   : > { %306 = vperm.xlu1 %2775, %v2877_v1   ;;  %296 = vperm.xlu0 %2774, %v2880_v2   ;;  %v2888_v4 = vld [vmem:[%s2874_s24 + $0x8] sm:$0xff]  ;;  %v2896_v6 = vld [vmem:[%s2874_s24 + $0x20] sm:$0xff]  ;;  %v2901_v7 = vld [vmem:[%s2874_s24 + $0x38] sm:$0xff] }
  0x13   : > { %v2893_v5 = vld [vmem:[%s2874_s24 + $0x28] sm:$0xff]  ;;  %v2904_v8 = vld [vmem:[%s2874_s24 + $0x30] sm:$0xff]  ;;  %v2912_v10 = vld [vmem:[%s2874_s24 + $0x40] sm:$0xff] }
  0x14   : > { %v2909_v9 = vld [vmem:[%s2874_s24 + $0x48] sm:$0xff]  ;;  %v2917_v11 = vld [vmem:[%s2874_s24 + $0x58] sm:$0xff]  ;;  %v2920_v12 = vld [vmem:[%s2874_s24 + $0x50] sm:$0xff] }
  0x15   : > { %v2925_v13 = vld [vmem:[%s2874_s24 + $0x68] sm:$0xff]  ;;  %v2928_v14 = vld [vmem:[%s2874_s24 + $0x60] sm:$0xff]  ;;  %v2933_v15 = vld [vmem:[%s2874_s24 + $0x78] sm:$0xff] }
  0x16   : > { %311 = vperm.xlu1 %2775, %v2885_v3   ;;  %301 = vperm.xlu0 %2774, %v2888_v4   ;;  %v2936_v16 = vld [vmem:[%s2874_s24 + $0x70] sm:$0xff]  ;;  %v2941_v17 = vld [vmem:[%s2874_s24 + $0x88] sm:$0xff]  ;;  %v2944_v18 = vld [vmem:[%s2874_s24 + $0x80] sm:$0xff] }
  0x17   : > { %v2949_v19 = vld [vmem:[%s2874_s24 + $0x98] sm:$0xff]  ;;  %v2952_v20 = vld [vmem:[%s2874_s24 + $0x90] sm:$0xff]  ;;  %v2957_v21 = vld [vmem:[%s2874_s24 + $0xa8] sm:$0xff] }
  0x18   : > { %v2960_v22 = vld [vmem:[%s2874_s24 + $0xa0] sm:$0xff]  ;;  %v2965_v23 = vld [vmem:[%s2874_s24 + $0xb8] sm:$0xff]  ;;  %v2968_v24 = vld [vmem:[%s2874_s24 + $0xb0] sm:$0xff] }
  0x19   : > { %v2973_v25 = vld [vmem:[%s2874_s24 + $0xc8] sm:$0xff]  ;;  %v2976_v26 = vld [vmem:[%s2874_s24 + $0xc0] sm:$0xff]  ;;  %v2981_v27 = vld [vmem:[%s2874_s24 + $0xd8] sm:$0xff] }
  0x1a   : > { %321 = vperm.xlu1 %2775, %v2893_v5   ;;  %316 = vperm.xlu0 %2774, %v2896_v6   ;;  %v2984_v28 = vld [vmem:[%s2874_s24 + $0xd0] sm:$0xff]  ;;  %v2989_v29 = vld [vmem:[%s2874_s24 + $0xe8] sm:$0xff]  ;;  %v2992_v30 = vld [vmem:[%s2874_s24 + $0xe0] sm:$0xff] }
  0x1b   : > { %v2997_v31 = vld [vmem:[%s2874_s24 + $0xf8] sm:$0xff]  ;;  %v3000_v32 = vld [vmem:[%s2874_s24 + $0xf0] sm:$0xff]  ;;  %v3005_v33 = vld [vmem:[%s2874_s24 + $0x108] sm:$0xff] }
  0x1c   : > { %v3008_v34 = vld [vmem:[%s2874_s24 + $0x100] sm:$0xff]  ;;  %v3013_v35 = vld [vmem:[%s2874_s24 + $0x118] sm:$0xff]  ;;  %v3016_v36 = vld [vmem:[%s2874_s24 + $0x110] sm:$0xff] }
  0x1d   : > { %v3021_v37 = vld [vmem:[%s2874_s24 + $0x128] sm:$0xff]  ;;  %v3024_v38 = vld [vmem:[%s2874_s24 + $0x120] sm:$0xff]  ;;  %v3029_v39 = vld [vmem:[%s2874_s24 + $0x138] sm:$0xff] }
  0x1e   : > { %331 = vperm.xlu1 %2775, %v2901_v7   ;;  %326 = vperm.xlu0 %2774, %v2904_v8   ;;  %v3032_v40 = vld [vmem:[%s2874_s24 + $0x130] sm:$0xff]  ;;  %v3037_v41 = vld [vmem:[%s2874_s24 + $0x148] sm:$0xff]  ;;  %v3040_v42 = vld [vmem:[%s2874_s24 + $0x140] sm:$0xff] }
  0x1f   : > { %v3045_v43 = vld [vmem:[%s2874_s24 + $0x158] sm:$0xff]  ;;  %v3048_v44 = vld [vmem:[%s2874_s24 + $0x150] sm:$0xff]  ;;  %v3053_v45 = vld [vmem:[%s2874_s24 + $0x168] sm:$0xff] }
  0x20   : > { %v3056_v46 = vld [vmem:[%s2874_s24 + $0x160] sm:$0xff]  ;;  %v3061_v47 = vld [vmem:[%s2874_s24 + $0x178] sm:$0xff]  ;;  %v3064_v48 = vld [vmem:[%s2874_s24 + $0x170] sm:$0xff] }
  0x21   : > { %v3069_v49 = vld [vmem:[%s2874_s24 + $0x188] sm:$0xff]  ;;  %v3072_v50 = vld [vmem:[%s2874_s24 + $0x180] sm:$0xff]  ;;  %v3077_v51 = vld [vmem:[%s2874_s24 + $0x198] sm:$0xff] }
  0x22   : > { %341 = vperm.xlu1 %2775, %v2909_v9   ;;  %336 = vperm.xlu0 %2774, %v2912_v10   ;;  %4593 = vst [vmem:[#allocation2_spill] sm:$0xff] %v3072_v50  ;;  %v3080_v52 = vld [vmem:[%s2874_s24 + $0x190] sm:$0xff]  ;;  %v3085_v53 = vld [vmem:[%s2874_s24 + $0x1a8] sm:$0xff]  ;;  %v3088_v54 = vld [vmem:[%s2874_s24 + $0x1a0] sm:$0xff] }
  0x23   : > { %4594 = vst [vmem:[#allocation3_spill] sm:$0xff] %v3080_v52  ;;  %4595 = vst [vmem:[#allocation4_spill] sm:$0xff] %v3085_v53  ;;  %v3093_v55 = vld [vmem:[%s2874_s24 + $0x1b8] sm:$0xff]  ;;  %v3096_v56 = vld [vmem:[%s2874_s24 + $0x1b0] sm:$0xff] }
  0x24   : > { %4596 = vst [vmem:[#allocation5_spill] sm:$0xff] %v3088_v54  ;;  %4597 = vst [vmem:[#allocation6_spill] sm:$0xff] %v3093_v55  ;;  %v3101_v57 = vld [vmem:[%s2874_s24 + $0x1c8] sm:$0xff]  ;;  %v3104_v58 = vld [vmem:[%s2874_s24 + $0x1c0] sm:$0xff] }
  0x25   : > { %4598 = vst [vmem:[#allocation7_spill] sm:$0xff] %v3096_v56  ;;  %4599 = vst [vmem:[#allocation8_spill] sm:$0xff] %v3101_v57  ;;  %v3109_v59 = vld [vmem:[%s2874_s24 + $0x1d8] sm:$0xff]  ;;  %v3112_v60 = vld [vmem:[%s2874_s24 + $0x1d0] sm:$0xff] }
  0x26   : > { %351 = vperm.xlu1 %2775, %v2917_v11   ;;  %346 = vperm.xlu0 %2774, %v2920_v12   ;;  %4600 = vst [vmem:[#allocation9_spill] sm:$0xff] %v3104_v58  ;;  %4601 = vst [vmem:[#allocation10_spill] sm:$0xff] %v3109_v59  ;;  %v3117_v61 = vld [vmem:[%s2874_s24 + $0x1e8] sm:$0xff]  ;;  %v3120_v62 = vld [vmem:[%s2874_s24 + $0x1e0] sm:$0xff] }
  0x27   : > { %4602 = vst [vmem:[#allocation11_spill] sm:$0xff] %v3112_v60  ;;  %4603 = vst [vmem:[#allocation12_spill] sm:$0xff] %v3117_v61  ;;  %v3125_v63 = vld [vmem:[%s2874_s24 + $0x1f8] sm:$0xff]  ;;  %v3128_v0 = vld [vmem:[%s2874_s24 + $0x1f0] sm:$0xff] }
  0x2a   : > { %361 = vperm.xlu1 %2775, %v2925_v13   ;;  %356 = vperm.xlu0 %2774, %v2928_v14  }
  0x2e   : > { %371 = vperm.xlu1 %2775, %v2933_v15   ;;  %366 = vperm.xlu0 %2774, %v2936_v16  }
  0x32   : > { %381 = vperm.xlu1 %2775, %v2941_v17   ;;  %376 = vperm.xlu0 %2774, %v2944_v18  }
  0x36   : > { %391 = vperm.xlu1 %2775, %v2949_v19   ;;  %386 = vperm.xlu0 %2774, %v2952_v20  }
  0x3a   : > { %401 = vperm.xlu1 %2775, %v2957_v21   ;;  %396 = vperm.xlu0 %2774, %v2960_v22  }
  0x3e   : > { %411 = vperm.xlu1 %2775, %v2965_v23   ;;  %406 = vperm.xlu0 %2774, %v2968_v24  }
  0x42   : > { %421 = vperm.xlu1 %2775, %v2973_v25   ;;  %416 = vperm.xlu0 %2774, %v2976_v26  }
  0x46   : > { %431 = vperm.xlu1 %2775, %v2981_v27   ;;  %426 = vperm.xlu0 %2774, %v2984_v28  }
  0x4a   : > { %441 = vperm.xlu1 %2775, %v2989_v29   ;;  %436 = vperm.xlu0 %2774, %v2992_v30  }
  0x4e   : > { %451 = vperm.xlu1 %2775, %v2997_v31   ;;  %446 = vperm.xlu0 %2774, %v3000_v32  }
  0x52   : > { %461 = vperm.xlu1 %2775, %v3005_v33   ;;  %456 = vperm.xlu0 %2774, %v3008_v34  }
  0x56   : > { %471 = vperm.xlu1 %2775, %v3013_v35   ;;  %466 = vperm.xlu0 %2774, %v3016_v36  }
  0x5a   : > { %481 = vperm.xlu1 %2775, %v3021_v37   ;;  %476 = vperm.xlu0 %2774, %v3024_v38  }
  0x5e   : > { %491 = vperm.xlu1 %2775, %v3029_v39   ;;  %486 = vperm.xlu0 %2774, %v3032_v40  }
  0x62   : > { %501 = vperm.xlu1 %2775, %v3037_v41   ;;  %496 = vperm.xlu0 %2774, %v3040_v42  }
  0x66   : > { %511 = vperm.xlu1 %2775, %v3045_v43   ;;  %506 = vperm.xlu0 %2774, %v3048_v44  }
  0x6a   : > { %521 = vperm.xlu1 %2775, %v3053_v45   ;;  %516 = vperm.xlu0 %2774, %v3056_v46  }
  0x6e   : > { %531 = vperm.xlu1 %2775, %v3061_v47   ;;  %526 = vperm.xlu0 %2774, %v3064_v48  }
  0x72   : > { %541 = vperm.xlu1 %2775, %v3069_v49   ;;  %536 = vperm.xlu0 %2774, %v3072_v50  }
  0x76   : > { %551 = vperm.xlu1 %2775, %v3077_v51   ;;  %546 = vperm.xlu0 %2774, %v3080_v52  }
  0x7a   : > { %561 = vperm.xlu1 %2775, %v3085_v53   ;;  %556 = vperm.xlu0 %2774, %v3088_v54  }
  0x7e   : > { %571 = vperm.xlu1 %2775, %v3093_v55   ;;  %566 = vperm.xlu0 %2774, %v3096_v56   ;;  %v2825_v55 = vmov 1  }
  0x82   : > { %581 = vperm.xlu1 %2775, %v3101_v57   ;;  %576 = vperm.xlu0 %2774, %v3104_v58  }
  0x86   : > { %591 = vperm.xlu1 %2775, %v3109_v59   ;;  %586 = vperm.xlu0 %2774, %v3112_v60  }
  0x8a   : > { %601 = vperm.xlu1 %2775, %v3117_v61   ;;  %596 = vperm.xlu0 %2774, %v3120_v62  }
  0x8d   : > { %v3130_v57 = vpop.permute.xlu1 %306  ;;  %v3132_v58 = vpop.permute.xlu0 %296 }
  0x8e   : > { %4604 = vst [vmem:[#allocation13_spill] sm:$0xff] %v3130_v57  ;;  %4605 = vst [vmem:[#allocation14_spill] sm:$0xff] %v3132_v58  ;;  %611 = vperm.xlu1 %2775, %v3125_v63   ;;  %606 = vperm.xlu0 %2774, %v3128_v0  }
  0x91   : > { %v3136_v59 = vpop.permute.xlu1 %311  ;;  %v3138_v60 = vpop.permute.xlu0 %301 }
  0x92   : > { %4606 = vst [vmem:[#allocation15_spill] sm:$0xff] %v3136_v59  ;;  %4607 = vst [vmem:[#allocation16_spill] sm:$0xff] %v3138_v60  ;;  %2777 = vset.pattern.permute.xlu1 %v2825_v55  ;;  %2776 = vset.pattern.permute.xlu0 %v2825_v55 }
  0x93   : > { %757 = vperm.xlu1 %2777, %v2888_v4   ;;  %753 = vperm.xlu0 %2776, %v2880_v2  }
  0x95   : > { %v3142_v61 = vpop.permute.xlu1 %321  ;;  %v3144_v57 = vpop.permute.xlu0 %316 }
  0x96   : > { %4608 = vst [vmem:[#allocation17_spill] sm:$0xff] %v3142_v61  ;;  %4609 = vst [vmem:[#allocation18_spill] sm:$0xff] %v3144_v57 }
  0x97   : > { %761 = vperm.xlu1 %2777, %v2877_v1   ;;  %765 = vperm.xlu0 %2776, %v2885_v3  }
  0x99   : > { %v3148_v58 = vpop.permute.xlu1 %331  ;;  %v3150_v59 = vpop.permute.xlu0 %326 }
  0x9a   : > { %4610 = vst [vmem:[#allocation19_spill] sm:$0xff] %v3148_v58  ;;  %4611 = vst [vmem:[#allocation20_spill] sm:$0xff] %v3150_v59 }
  0x9b   : > { %769 = vperm.xlu1 %2777, %v2896_v6   ;;  %773 = vperm.xlu0 %2776, %v2893_v5  }
  0x9d   : > { %v3154_v55 = vpop.permute.xlu1 %341  ;;  %v3156_v60 = vpop.permute.xlu0 %336 }
  0x9e   : > { %4612 = vst [vmem:[#allocation21_spill] sm:$0xff] %v3154_v55  ;;  %4613 = vst [vmem:[#allocation22_spill] sm:$0xff] %v3156_v60 }
  0x9f   : > { %777 = vperm.xlu1 %2777, %v2904_v8   ;;  %781 = vperm.xlu0 %2776, %v2901_v7  }
  0xa1   : > { %v3160_v57 = vpop.permute.xlu1 %351  ;;  %v3162_v61 = vpop.permute.xlu0 %346 }
  0xa2   : > { %4614 = vst [vmem:[#allocation23_spill] sm:$0xff] %v3160_v57  ;;  %4615 = vst [vmem:[#allocation24_spill] sm:$0xff] %v3162_v61 }
  0xa3   : > { %785 = vperm.xlu1 %2777, %v2912_v10   ;;  %789 = vperm.xlu0 %2776, %v2909_v9  }
  0xa5   : > { %v3166_v59 = vpop.permute.xlu1 %361  ;;  %v3168_v58 = vpop.permute.xlu0 %356 }
  0xa6   : > { %4616 = vst [vmem:[#allocation25_spill] sm:$0xff] %v3166_v59  ;;  %4617 = vst [vmem:[#allocation26_spill] sm:$0xff] %v3168_v58 }
  0xa7   : > { %793 = vperm.xlu1 %2777, %v2920_v12   ;;  %797 = vperm.xlu0 %2776, %v2917_v11  }
  0xa9   : > { %v3172_v60 = vpop.permute.xlu1 %371  ;;  %v3174_v55 = vpop.permute.xlu0 %366 }
  0xaa   : > { %4618 = vst [vmem:[#allocation27_spill] sm:$0xff] %v3172_v60  ;;  %4619 = vst [vmem:[#allocation28_spill] sm:$0xff] %v3174_v55 }
  0xab   : > { %801 = vperm.xlu1 %2777, %v2928_v14   ;;  %805 = vperm.xlu0 %2776, %v2925_v13  }
  0xad   : > { %v3178_v61 = vpop.permute.xlu1 %381  ;;  %v3180_v57 = vpop.permute.xlu0 %376 }
  0xae   : > { %4620 = vst [vmem:[#allocation29_spill] sm:$0xff] %v3178_v61  ;;  %4621 = vst [vmem:[#allocation30_spill] sm:$0xff] %v3180_v57 }
  0xaf   : > { %809 = vperm.xlu1 %2777, %v2936_v16   ;;  %813 = vperm.xlu0 %2776, %v2933_v15  }
  0xb1   : > { %v3184_v58 = vpop.permute.xlu1 %391  ;;  %v3186_v59 = vpop.permute.xlu0 %386 }
  0xb2   : > { %4622 = vst [vmem:[#allocation31_spill] sm:$0xff] %v3184_v58  ;;  %4623 = vst [vmem:[#allocation32_spill] sm:$0xff] %v3186_v59 }
  0xb3   : > { %817 = vperm.xlu1 %2777, %v2944_v18   ;;  %821 = vperm.xlu0 %2776, %v2941_v17  }
  0xb5   : > { %v3190_v55 = vpop.permute.xlu1 %401  ;;  %v3192_v60 = vpop.permute.xlu0 %396 }
  0xb6   : > { %4624 = vst [vmem:[#allocation33_spill] sm:$0xff] %v3190_v55  ;;  %4625 = vst [vmem:[#allocation34_spill] sm:$0xff] %v3192_v60 }
  0xb7   : > { %825 = vperm.xlu1 %2777, %v2952_v20   ;;  %829 = vperm.xlu0 %2776, %v2949_v19  }
  0xb9   : > { %v3196_v61 = vpop.permute.xlu1 %411  ;;  %v3198_v57 = vpop.permute.xlu0 %406 }
  0xba   : > { %4626 = vst [vmem:[#allocation35_spill] sm:$0xff] %v3196_v61  ;;  %4627 = vst [vmem:[#allocation36_spill] sm:$0xff] %v3198_v57 }
  0xbb   : > { %833 = vperm.xlu1 %2777, %v2960_v22   ;;  %837 = vperm.xlu0 %2776, %v2957_v21  }
  0xbd   : > { %v3202_v59 = vpop.permute.xlu1 %421  ;;  %v3204_v58 = vpop.permute.xlu0 %416 }
  0xbe   : > { %4628 = vst [vmem:[#allocation37_spill] sm:$0xff] %v3202_v59  ;;  %4629 = vst [vmem:[#allocation38_spill] sm:$0xff] %v3204_v58 }
  0xbf   : > { %841 = vperm.xlu1 %2777, %v2968_v24   ;;  %845 = vperm.xlu0 %2776, %v2965_v23  }
  0xc1   : > { %v3208_v60 = vpop.permute.xlu1 %431  ;;  %v3210_v55 = vpop.permute.xlu0 %426 }
  0xc2   : > { %4630 = vst [vmem:[#allocation39_spill] sm:$0xff] %v3208_v60  ;;  %4631 = vst [vmem:[#allocation40_spill] sm:$0xff] %v3210_v55 }
  0xc3   : > { %849 = vperm.xlu1 %2777, %v2976_v26   ;;  %853 = vperm.xlu0 %2776, %v2973_v25  }
  0xc5   : > { %v3214_v57 = vpop.permute.xlu1 %441  ;;  %v3216_v61 = vpop.permute.xlu0 %436 }
  0xc6   : > { %4632 = vst [vmem:[#allocation41_spill] sm:$0xff] %v3214_v57  ;;  %4633 = vst [vmem:[#allocation42_spill] sm:$0xff] %v3216_v61 }
  0xc7   : > { %857 = vperm.xlu1 %2777, %v2984_v28   ;;  %861 = vperm.xlu0 %2776, %v2981_v27  }
  0xc9   : > { %v3220_v58 = vpop.permute.xlu1 %451  ;;  %v3222_v59 = vpop.permute.xlu0 %446 }
  0xca   : > { %4634 = vst [vmem:[#allocation43_spill] sm:$0xff] %v3220_v58  ;;  %4635 = vst [vmem:[#allocation44_spill] sm:$0xff] %v3222_v59 }
  0xcb   : > { %865 = vperm.xlu1 %2777, %v2992_v30   ;;  %869 = vperm.xlu0 %2776, %v2989_v29  }
  0xcd   : > { %v3226_v55 = vpop.permute.xlu1 %461  ;;  %v3228_v60 = vpop.permute.xlu0 %456 }
  0xce   : > { %4636 = vst [vmem:[#allocation45_spill] sm:$0xff] %v3226_v55  ;;  %4637 = vst [vmem:[#allocation46_spill] sm:$0xff] %v3228_v60 }
  0xcf   : > { %873 = vperm.xlu1 %2777, %v3000_v32   ;;  %877 = vperm.xlu0 %2776, %v2997_v31  }
  0xd1   : > { %v3232_v61 = vpop.permute.xlu1 %471  ;;  %v3234_v57 = vpop.permute.xlu0 %466 }
  0xd2   : > { %4638 = vst [vmem:[#allocation47_spill] sm:$0xff] %v3232_v61  ;;  %4639 = vst [vmem:[#allocation48_spill] sm:$0xff] %v3234_v57 }
  0xd3   : > { %881 = vperm.xlu1 %2777, %v3008_v34   ;;  %885 = vperm.xlu0 %2776, %v3005_v33  }
  0xd5   : > { %v3238_v59 = vpop.permute.xlu1 %481  ;;  %v3240_v58 = vpop.permute.xlu0 %476 }
  0xd6   : > { %4640 = vst [vmem:[#allocation49_spill] sm:$0xff] %v3238_v59  ;;  %4641 = vst [vmem:[#allocation50_spill] sm:$0xff] %v3240_v58 }
  0xd7   : > { %889 = vperm.xlu1 %2777, %v3016_v36   ;;  %893 = vperm.xlu0 %2776, %v3013_v35  }
  0xd9   : > { %v3244_v60 = vpop.permute.xlu1 %491  ;;  %v3246_v55 = vpop.permute.xlu0 %486 }
  0xda   : > { %4642 = vst [vmem:[#allocation51_spill] sm:$0xff] %v3244_v60  ;;  %4643 = vst [vmem:[#allocation52_spill] sm:$0xff] %v3246_v55 }
  0xdb   : > { %897 = vperm.xlu1 %2777, %v3024_v38   ;;  %901 = vperm.xlu0 %2776, %v3021_v37  }
  0xdd   : > { %v3250_v57 = vpop.permute.xlu1 %501  ;;  %v3252_v61 = vpop.permute.xlu0 %496 }
  0xde   : > { %4644 = vst [vmem:[#allocation53_spill] sm:$0xff] %v3250_v57  ;;  %4645 = vst [vmem:[#allocation54_spill] sm:$0xff] %v3252_v61 }
  0xdf   : > { %905 = vperm.xlu1 %2777, %v3032_v40   ;;  %909 = vperm.xlu0 %2776, %v3029_v39  }
  0xe1   : > { %v3256_v58 = vpop.permute.xlu1 %511  ;;  %v3258_v59 = vpop.permute.xlu0 %506 }
  0xe2   : > { %4646 = vst [vmem:[#allocation55_spill] sm:$0xff] %v3256_v58  ;;  %4647 = vst [vmem:[#allocation56_spill] sm:$0xff] %v3258_v59 }
  0xe3   : > { %913 = vperm.xlu1 %2777, %v3040_v42   ;;  %917 = vperm.xlu0 %2776, %v3037_v41  }
  0xe5   : > { %v3262_v55 = vpop.permute.xlu1 %521  ;;  %v3264_v60 = vpop.permute.xlu0 %516 }
  0xe6   : > { %4648 = vst [vmem:[#allocation57_spill] sm:$0xff] %v3262_v55  ;;  %4649 = vst [vmem:[#allocation58_spill] sm:$0xff] %v3264_v60 }
  0xe7   : > { %921 = vperm.xlu1 %2777, %v3048_v44   ;;  %925 = vperm.xlu0 %2776, %v3045_v43  }
  0xe9   : > { %v3268_v61 = vpop.permute.xlu1 %531  ;;  %v3270_v57 = vpop.permute.xlu0 %526 }
  0xea   : > { %4650 = vst [vmem:[#allocation59_spill] sm:$0xff] %v3268_v61  ;;  %4651 = vst [vmem:[#allocation60_spill] sm:$0xff] %v3270_v57 }
  0xeb   : > { %929 = vperm.xlu1 %2777, %v3056_v46   ;;  %933 = vperm.xlu0 %2776, %v3053_v45  }
  0xed   : > { %v3274_v59 = vpop.permute.xlu1 %541  ;;  %v3276_v58 = vpop.permute.xlu0 %536 }
  0xee   : > { %4652 = vst [vmem:[#allocation61_spill] sm:$0xff] %v3274_v59  ;;  %4653 = vst [vmem:[#allocation62_spill] sm:$0xff] %v3276_v58 }
  0xef   : > { %937 = vperm.xlu1 %2777, %v3064_v48   ;;  %941 = vperm.xlu0 %2776, %v3061_v47  }
  0xf1   : > { %v3280_v60 = vpop.permute.xlu1 %551  ;;  %v3282_v55 = vpop.permute.xlu0 %546 }
  0xf2   : > { %4654 = vst [vmem:[#allocation63_spill] sm:$0xff] %v3280_v60  ;;  %4655 = vst [vmem:[#allocation64_spill] sm:$0xff] %v3282_v55 }
  0xf3   : > { %945 = vperm.xlu1 %2777, %v3072_v50   ;;  %949 = vperm.xlu0 %2776, %v3069_v49   ;;  %v4665_v50 = vld [vmem:[#allocation9_spill] sm:$0xff] }
  0xf5   : > { %v3286_v61 = vpop.permute.xlu1 %561  ;;  %v3288_v57 = vpop.permute.xlu0 %556 }
  0xf6   : > { %4656 = vst [vmem:[#allocation65_spill] sm:$0xff] %v3286_v61  ;;  %4657 = vst [vmem:[#allocation66_spill] sm:$0xff] %v3288_v57  ;;  %v4662_v61 = vld [vmem:[#allocation6_spill] sm:$0xff] }
  0xf7   : > { %953 = vperm.xlu1 %2777, %v3080_v52   ;;  %957 = vperm.xlu0 %2776, %v3077_v51  }
  0xf9   : > { %v3292_v58 = vpop.permute.xlu1 %571  ;;  %v3294_v59 = vpop.permute.xlu0 %566 }
  0xfa   : > { %4658 = vst [vmem:[#allocation67_spill] sm:$0xff] %v3292_v58  ;;  %4659 = vst [vmem:[#allocation68_spill] sm:$0xff] %v3294_v59  ;;  %v4666_v58 = vld [vmem:[#allocation8_spill] sm:$0xff] }
  0xfb   : > { %961 = vperm.xlu1 %2777, %v3088_v54   ;;  %965 = vperm.xlu0 %2776, %v3085_v53   ;;  %v4669_v53 = vld [vmem:[#allocation11_spill] sm:$0xff] }
  0xfd   : > { %v3298_v60 = vpop.permute.xlu1 %581  ;;  %v3300_v55 = vpop.permute.xlu0 %576 }
  0xfe   : > { %4660 = vst [vmem:[#allocation69_spill] sm:$0xff] %v3298_v60  ;;  %4661 = vst [vmem:[#allocation70_spill] sm:$0xff] %v3300_v55  ;;  %v4670_v60 = vld [vmem:[#allocation10_spill] sm:$0xff] }
  0xff   : > { %969 = vperm.xlu1 %2777, %v3096_v56   ;;  %973 = vperm.xlu0 %2776, %v4662_v61  }
 0x101   : > { %v3304_v57 = vpop.permute.xlu1 %591  ;;  %v3306_v52 = vpop.permute.xlu0 %586 }
 0x102   : > { %4663 = vst [vmem:[#allocation6_spill] sm:$0xff] %v3304_v57  ;;  %4664 = vst [vmem:[#allocation71_spill] sm:$0xff] %v3306_v52  ;;  %v4673_v57 = vld [vmem:[#allocation12_spill] sm:$0xff] }
 0x103   : > { %977 = vperm.xlu1 %2777, %v4665_v50   ;;  %981 = vperm.xlu0 %2776, %v4666_v58  }
 0x105   : > { %v3310_v59 = vpop.permute.xlu1 %601  ;;  %v3312_v54 = vpop.permute.xlu0 %596 }
 0x106   : > { %4667 = vst [vmem:[#allocation9_spill] sm:$0xff] %v3310_v59  ;;  %4668 = vst [vmem:[#allocation8_spill] sm:$0xff] %v3312_v54  ;;  %v4585_v54 = vmov 2  }
 0x107   : > { %985 = vperm.xlu1 %2777, %v4669_v53   ;;  %989 = vperm.xlu0 %2776, %v4670_v60  }
 0x109   : > { %v3316_v55 = vpop.permute.xlu1 %611  ;;  %v3318_v56 = vpop.permute.xlu0 %606 }
 0x10a   : > { %4671 = vst [vmem:[#allocation11_spill] sm:$0xff] %v3316_v55  ;;  %4672 = vst [vmem:[#allocation10_spill] sm:$0xff] %v3318_v56 }
 0x10b   : > { %993 = vperm.xlu1 %2777, %v3120_v62   ;;  %997 = vperm.xlu0 %2776, %v4673_v57  }
 0x10e   : > { %v3322_v52 = vpop.permute.xlu1 %757  ;;  %v3324_v50 = vpop.permute.xlu0 %753 }
 0x10f   : > { %1001 = vperm.xlu1 %2777, %v3128_v0   ;;  %1005 = vperm.xlu0 %2776, %v3125_v63  }
 0x112   : > { %v3328_v59 = vpop.permute.xlu1 %761  ;;  %v3330_v53 = vpop.permute.xlu0 %765 }
 0x113   : > { %4674 = vst [vmem:[#allocation12_spill] sm:$0xff] %v3330_v53  ;;  %2778 = vset.pattern.permute.xlu1 %v4585_v54  ;;  %2779 = vset.pattern.permute.xlu0 %v4585_v54 }
 0x114   : > { %1141 = vperm.xlu1 %2778, %v2880_v2   ;;  %1145 = vperm.xlu0 %2779, %v2888_v4  }
 0x116   : > { %v3336_v62 = vpop.permute.xlu1 %769  ;;  %v3338_v55 = vpop.permute.xlu0 %773 }
 0x117   : > { %4675 = vst [vmem:[#allocation72_spill] sm:$0xff] %v3336_v62  ;;  %4676 = vst [vmem:[#allocation73_spill] sm:$0xff] %v3338_v55 }
 0x118   : > { %1149 = vperm.xlu1 %2778, %v2877_v1   ;;  %1157 = vperm.xlu0 %2779, %v2896_v6  }
 0x11a   : > { %v3342_v0 = vpop.permute.xlu1 %777  ;;  %v3344_v56 = vpop.permute.xlu0 %781 }
 0x11b   : > { %4677 = vst [vmem:[#allocation74_spill] sm:$0xff] %v3342_v0  ;;  %4678 = vst [vmem:[#allocation75_spill] sm:$0xff] %v3344_v56 }
 0x11c   : > { %1153 = vperm.xlu1 %2778, %v2885_v3   ;;  %1165 = vperm.xlu0 %2779, %v2904_v8  }
 0x11e   : > { %v3348_v54 = vpop.permute.xlu1 %785  ;;  %v3350_v53 = vpop.permute.xlu0 %789 }
 0x11f   : > { %4679 = vst [vmem:[#allocation76_spill] sm:$0xff] %v3348_v54  ;;  %4680 = vst [vmem:[#allocation77_spill] sm:$0xff] %v3350_v53 }
 0x120   : > { %1161 = vperm.xlu1 %2778, %v2893_v5   ;;  %1173 = vperm.xlu0 %2779, %v2912_v10  }
 0x122   : > { %v3354_v55 = vpop.permute.xlu1 %793  ;;  %v3356_v62 = vpop.permute.xlu0 %797 }
 0x123   : > { %4681 = vst [vmem:[#allocation78_spill] sm:$0xff] %v3354_v55  ;;  %4682 = vst [vmem:[#allocation79_spill] sm:$0xff] %v3356_v62 }
 0x124   : > { %1169 = vperm.xlu1 %2778, %v2901_v7   ;;  %1181 = vperm.xlu0 %2779, %v2920_v12  }
 0x126   : > { %v3360_v56 = vpop.permute.xlu1 %801  ;;  %v3362_v0 = vpop.permute.xlu0 %805 }
 0x127   : > { %4683 = vst [vmem:[#allocation80_spill] sm:$0xff] %v3360_v56  ;;  %4684 = vst [vmem:[#allocation81_spill] sm:$0xff] %v3362_v0 }
 0x128   : > { %1177 = vperm.xlu1 %2778, %v2909_v9   ;;  %1189 = vperm.xlu0 %2779, %v2928_v14  }
 0x12a   : > { %v3366_v53 = vpop.permute.xlu1 %809  ;;  %v3368_v54 = vpop.permute.xlu0 %813 }
 0x12b   : > { %4685 = vst [vmem:[#allocation82_spill] sm:$0xff] %v3366_v53  ;;  %4686 = vst [vmem:[#allocation83_spill] sm:$0xff] %v3368_v54 }
 0x12c   : > { %1185 = vperm.xlu1 %2778, %v2917_v11   ;;  %1197 = vperm.xlu0 %2779, %v2936_v16  }
 0x12e   : > { %v3372_v62 = vpop.permute.xlu1 %817  ;;  %v3374_v55 = vpop.permute.xlu0 %821 }
 0x12f   : > { %4687 = vst [vmem:[#allocation84_spill] sm:$0xff] %v3372_v62  ;;  %4688 = vst [vmem:[#allocation85_spill] sm:$0xff] %v3374_v55 }
 0x130   : > { %1193 = vperm.xlu1 %2778, %v2925_v13   ;;  %1205 = vperm.xlu0 %2779, %v2944_v18  }
 0x132   : > { %v3378_v0 = vpop.permute.xlu1 %825  ;;  %v3380_v56 = vpop.permute.xlu0 %829 }
 0x133   : > { %4689 = vst [vmem:[#allocation86_spill] sm:$0xff] %v3378_v0  ;;  %4690 = vst [vmem:[#allocation87_spill] sm:$0xff] %v3380_v56 }
 0x134   : > { %1201 = vperm.xlu1 %2778, %v2933_v15   ;;  %1213 = vperm.xlu0 %2779, %v2952_v20  }
 0x136   : > { %v3384_v54 = vpop.permute.xlu1 %833  ;;  %v3386_v53 = vpop.permute.xlu0 %837 }
 0x137   : > { %4691 = vst [vmem:[#allocation88_spill] sm:$0xff] %v3384_v54  ;;  %4692 = vst [vmem:[#allocation89_spill] sm:$0xff] %v3386_v53 }
 0x138   : > { %1209 = vperm.xlu1 %2778, %v2941_v17   ;;  %1221 = vperm.xlu0 %2779, %v2960_v22  }
 0x13a   : > { %v3390_v55 = vpop.permute.xlu1 %841  ;;  %v3392_v62 = vpop.permute.xlu0 %845 }
 0x13b   : > { %4693 = vst [vmem:[#allocation90_spill] sm:$0xff] %v3390_v55  ;;  %4694 = vst [vmem:[#allocation91_spill] sm:$0xff] %v3392_v62  ;;  %v1993_v62 = vld [vmem:[%s4563_s3 + $0x68] sm:$0xff] }
 0x13c   : > { %1217 = vperm.xlu1 %2778, %v2949_v19   ;;  %1229 = vperm.xlu0 %2779, %v2968_v24  }
 0x13e   : > { %v3396_v0 = vpop.permute.xlu1 %849  ;;  %v3398_v56 = vpop.permute.xlu0 %853 }
 0x13f   : > { %4695 = vst [vmem:[#allocation92_spill] sm:$0xff] %v3396_v0  ;;  %4696 = vst [vmem:[#allocation93_spill] sm:$0xff] %v3398_v56 }
 0x140   : > { %1225 = vperm.xlu1 %2778, %v2957_v21   ;;  %1237 = vperm.xlu0 %2779, %v2976_v26  }
 0x142   : > { %v3402_v54 = vpop.permute.xlu1 %857  ;;  %v3404_v53 = vpop.permute.xlu0 %861 }
 0x143   : > { %4697 = vst [vmem:[#allocation94_spill] sm:$0xff] %v3402_v54  ;;  %4698 = vst [vmem:[#allocation95_spill] sm:$0xff] %v3404_v53 }
 0x144   : > { %1233 = vperm.xlu1 %2778, %v2965_v23   ;;  %1245 = vperm.xlu0 %2779, %v2984_v28  }
 0x146   : > { %v3408_v22 = vpop.permute.xlu1 %865  ;;  %v3410_v55 = vpop.permute.xlu0 %869 }
 0x147   : > { %4699 = vst [vmem:[#allocation96_spill] sm:$0xff] %v3408_v22  ;;  %4700 = vst [vmem:[#allocation97_spill] sm:$0xff] %v3410_v55  ;;  %v1995_v55 = vld [vmem:[%s4563_s3 + $0x78] sm:$0xff] }
 0x148   : > { %1241 = vperm.xlu1 %2778, %v2973_v25   ;;  %1253 = vperm.xlu0 %2779, %v2992_v30  }
 0x149   : > { %2602 = vmatprep.subr.mxu0 %v1995_v55  ;;  %2730 = vmatprep.subr.mxu1 %v1995_v55 }
 0x14a   : > { %v3414_v24 = vpop.permute.xlu1 %873  ;;  %v3416_v0 = vpop.permute.xlu0 %877  ;;  %2603 = vmatpush3.msra.mxu0 %v1995_v55  ;;  %2746 = vmatpush3.msra.mxu1 %v1995_v55  ;;  %v1992_v55 = vld [vmem:[%s4563_s3 + $0x60] sm:$0xff] }
 0x14b   : > { %4701 = vst [vmem:[#allocation98_spill] sm:$0xff] %v3414_v24  ;;  %4702 = vst [vmem:[#allocation99_spill] sm:$0xff] %v3416_v0 }
 0x14c   : > { %1249 = vperm.xlu1 %2778, %v2981_v27   ;;  %1261 = vperm.xlu0 %2779, %v3000_v32  }
 0x14e   : > { %v3420_v26 = vpop.permute.xlu1 %881  ;;  %v3422_v54 = vpop.permute.xlu0 %885 }
 0x150   : > { %1257 = vperm.xlu1 %2778, %v2989_v29   ;;  %1269 = vperm.xlu0 %2779, %v3008_v34  }
 0x152   : > { %v3426_v28 = vpop.permute.xlu1 %889  ;;  %v3428_v22 = vpop.permute.xlu0 %893 }
 0x154   : > { %1265 = vperm.xlu1 %2778, %v2997_v31   ;;  %1277 = vperm.xlu0 %2779, %v3016_v36   ;;  %v1994_v31 = vld [vmem:[%s4563_s3 + $0x70] sm:$0xff] }
 0x155   : > { %2604 = vmatprep.subr.mxu0 %v1994_v31  ;;  %2731 = vmatprep.subr.mxu1 %v1994_v31 }
 0x156   : > { %v3432_v30 = vpop.permute.xlu1 %897  ;;  %v3434_v24 = vpop.permute.xlu0 %901  ;;  %2605 = vmatpush3.msra.mxu0 %v1994_v31  ;;  %2747 = vmatpush3.msra.mxu1 %v1994_v31  ;;  %v1991_v31 = vld [vmem:[%s4563_s3 + $0x58] sm:$0xff] }
 0x157   : > { %2606 = vmatprep.subr.mxu0 %v1993_v62  ;;  %2732 = vmatprep.subr.mxu1 %v1993_v62 }
 0x158   : > { %1273 = vperm.xlu1 %2778, %v3005_v33   ;;  %1285 = vperm.xlu0 %2779, %v3024_v38  }
 0x159   : > { %2607 = vmatpush3.msra.mxu0 %v1993_v62  ;;  %2748 = vmatpush3.msra.mxu1 %v1993_v62  ;;  %v1990_v62 = vld [vmem:[%s4563_s3 + $0x50] sm:$0xff] }
 0x15a   : > { %v3438_v32 = vpop.permute.xlu1 %905  ;;  %v3440_v0 = vpop.permute.xlu0 %909  ;;  %2608 = vmatprep.subr.mxu0 %v1992_v55  ;;  %2733 = vmatprep.subr.mxu1 %v1992_v55 }
 0x15b   : > { %4703 = vst [vmem:[#allocation100_spill] sm:$0xff] %v3438_v32  ;;  %4704 = vst [vmem:[#allocation101_spill] sm:$0xff] %v3440_v0  ;;  %2609 = vmatpush3.msra.mxu0 %v1992_v55  ;;  %2749 = vmatpush3.msra.mxu1 %v1992_v55  ;;  %v1989_v55 = vld [vmem:[%s4563_s3 + $0x48] sm:$0xff] }
 0x15c   : > { %1281 = vperm.xlu1 %2778, %v3013_v35   ;;  %1293 = vperm.xlu0 %2779, %v3032_v40  }
 0x15d   : > { %2610 = vmatprep.subr.mxu0 %v1991_v31  ;;  %2734 = vmatprep.subr.mxu1 %v1991_v31 }
 0x15e   : > { %v3450_v53 = vpop.permute.xlu1 %913  ;;  %v3452_v56 = vpop.permute.xlu0 %917  ;;  %2611 = vmatpush3.msra.mxu0 %v1991_v31  ;;  %2750 = vmatpush3.msra.mxu1 %v1991_v31  ;;  %v1988_v31 = vld [vmem:[%s4563_s3 + $0x40] sm:$0xff] }
 0x15f   : > { %4705 = vst [vmem:[#allocation102_spill] sm:$0xff] %v3450_v53  ;;  %4706 = vst [vmem:[#allocation103_spill] sm:$0xff] %v3452_v56  ;;  %2612 = vmatprep.subr.mxu0 %v1990_v62  ;;  %2735 = vmatprep.subr.mxu1 %v1990_v62 }
 0x160   : > { %1289 = vperm.xlu1 %2778, %v3021_v37   ;;  %1301 = vperm.xlu0 %2779, %v3040_v42  }
 0x161   : > { %2613 = vmatpush3.msra.mxu0 %v1990_v62  ;;  %2751 = vmatpush3.msra.mxu1 %v1990_v62  ;;  %v1987_v62 = vld [vmem:[%s4563_s3 + $0x38] sm:$0xff] }
 0x162   : > { %v3462_v53 = vpop.permute.xlu1 %921  ;;  %v3464_v56 = vpop.permute.xlu0 %925  ;;  %2614 = vmatprep.subr.mxu0 %v1989_v55  ;;  %2736 = vmatprep.subr.mxu1 %v1989_v55 }
 0x163   : > { %4707 = vst [vmem:[#allocation104_spill] sm:$0xff] %v3462_v53  ;;  %4708 = vst [vmem:[#allocation105_spill] sm:$0xff] %v3464_v56  ;;  %2615 = vmatpush3.msra.mxu0 %v1989_v55  ;;  %2752 = vmatpush3.msra.mxu1 %v1989_v55  ;;  %v1986_v55 = vld [vmem:[%s4563_s3 + $0x30] sm:$0xff] }
 0x164   : > { %1297 = vperm.xlu1 %2778, %v3029_v39   ;;  %1309 = vperm.xlu0 %2779, %v3048_v44  }
 0x165   : > { %2616 = vmatprep.subr.mxu0 %v1988_v31  ;;  %2737 = vmatprep.subr.mxu1 %v1988_v31 }
 0x166   : > { %v3471_v0 = vpop.permute.xlu1 %929  ;;  %v3473_v32 = vpop.permute.xlu0 %933  ;;  %2617 = vmatpush3.msra.mxu0 %v1988_v31  ;;  %2753 = vmatpush3.msra.mxu1 %v1988_v31  ;;  %v1985_v31 = vld [vmem:[%s4563_s3 + $0x28] sm:$0xff] }
 0x167   : > { %4709 = vst [vmem:[#allocation106_spill] sm:$0xff] %v3471_v0  ;;  %4710 = vst [vmem:[#allocation107_spill] sm:$0xff] %v3473_v32  ;;  %2618 = vmatprep.subr.mxu0 %v1987_v62  ;;  %2738 = vmatprep.subr.mxu1 %v1987_v62 }
 0x168   : > { %1305 = vperm.xlu1 %2778, %v3037_v41   ;;  %1317 = vperm.xlu0 %2779, %v3056_v46  }
 0x169   : > { %2619 = vmatpush3.msra.mxu0 %v1987_v62  ;;  %2754 = vmatpush3.msra.mxu1 %v1987_v62 }
 0x16a   : > { %v3483_v0 = vpop.permute.xlu1 %937  ;;  %v3485_v32 = vpop.permute.xlu0 %941  ;;  %2620 = vmatprep.subr.mxu0 %v1986_v55  ;;  %2739 = vmatprep.subr.mxu1 %v1986_v55 }
 0x16b   : > { %4711 = vst [vmem:[#allocation108_spill] sm:$0xff] %v3483_v0  ;;  %4712 = vst [vmem:[#allocation109_spill] sm:$0xff] %v3485_v32  ;;  %v4587_v32 = vmov 3   ;;  %2621 = vmatpush3.msra.mxu0 %v1986_v55  ;;  %2755 = vmatpush3.msra.mxu1 %v1986_v55  ;;  %v1981_v55 = vld [vmem:[%s4563_s3 + $0x8] sm:$0xff]  ;;  %v4721_v0 = vld [vmem:[#allocation4_spill] sm:$0xff] }
 0x16c   : > { %1313 = vperm.xlu1 %2778, %v3045_v43   ;;  %1325 = vperm.xlu0 %2779, %v3064_v48  }
 0x16d   : > { %2622 = vmatprep.subr.mxu0 %v1985_v31  ;;  %2740 = vmatprep.subr.mxu1 %v1985_v31 }
 0x16e   : > { %v3492_v56 = vpop.permute.xlu1 %945  ;;  %v3494_v53 = vpop.permute.xlu0 %949  ;;  %2623 = vmatpush3.msra.mxu0 %v1985_v31  ;;  %2756 = vmatpush3.msra.mxu1 %v1985_v31 }
 0x16f   : > { %4713 = vst [vmem:[#allocation110_spill] sm:$0xff] %v3492_v56  ;;  %4714 = vst [vmem:[#allocation111_spill] sm:$0xff] %v3494_v53 }
 0x170   : > { %1321 = vperm.xlu1 %2778, %v3053_v45   ;;  %1329 = vperm.xlu0 %2779, %v3061_v47  }
 0x172   : > { %v3504_v56 = vpop.permute.xlu1 %953  ;;  %v3506_v53 = vpop.permute.xlu0 %957 }
 0x173   : > { %4715 = vst [vmem:[#allocation112_spill] sm:$0xff] %v3504_v56  ;;  %4716 = vst [vmem:[#allocation113_spill] sm:$0xff] %v3506_v53  ;;  %v1984_v53 = vld [vmem:[%s4563_s3 + $0x20] sm:$0xff] }
 0x174   : > { %2780 = vset.pattern.permute.xlu1 %v4587_v32  ;;  %1337 = vperm.xlu0 %2779, %v3069_v49   ;;  %v1983_v32 = vld [vmem:[%s4563_s3 + $0x18] sm:$0xff] }
 0x175   : > { %1529 = vperm.xlu1 %2780, %v2880_v2   ;;  %2624 = vmatprep.subr.mxu0 %v1984_v53  ;;  %v1982_v2 = vld [vmem:[%s4563_s3 + $0x10] sm:$0xff] }
 0x176   : > { %v3517_v56 = vpop.permute.xlu1 %961  ;;  %v3519_v62 = vpop.permute.xlu0 %965  ;;  %2625 = vmatpush3.msra.mxu0 %v1984_v53  ;;  %2741 = vmatprep.subr.mxu1 %v1984_v53 }
 0x177   : > { %4717 = vst [vmem:[#allocation114_spill] sm:$0xff] %v3517_v56  ;;  %4718 = vst [vmem:[#allocation115_spill] sm:$0xff] %v3519_v62  ;;  %2626 = vmatprep.subr.mxu0 %v1983_v32  ;;  %2757 = vmatpush3.msra.mxu1 %v1984_v53 }
 0x178   : > { %1345 = vperm.xlu0 %2779, %v3077_v51   ;;  %2627 = vmatpush3.msra.mxu0 %v1983_v32 }
 0x179   : > { %1533 = vperm.xlu1 %2780, %v2888_v4   ;;  %2628 = vmatprep.subr.mxu0 %v1982_v2  ;;  %v1980_v4 = vld [vmem:[%s4563_s3] sm:$0xff] }
 0x17a   : > { %v3529_v56 = vpop.permute.xlu1 %969  ;;  %v3531_v62 = vpop.permute.xlu0 %973  ;;  %2629 = vmatpush3.msra.mxu0 %v1982_v2  ;;  %2742 = vmatprep.subr.mxu1 %v1983_v32 }
 0x17b   : > { %4719 = vst [vmem:[#allocation116_spill] sm:$0xff] %v3529_v56  ;;  %4720 = vst [vmem:[#allocation117_spill] sm:$0xff] %v3531_v62  ;;  %2630 = vmatprep.subr.mxu0 %v1981_v55  ;;  %2758 = vmatpush3.msra.mxu1 %v1983_v32 }
 0x17c   : > { %1353 = vperm.xlu0 %2779, %v4721_v0   ;;  %2631 = vmatpush3.msra.mxu0 %v1981_v55 }
 0x17d   : > { %1661 = vperm.xlu1 %2780, %v3005_v33   ;;  %2632 = vmatprep.subr.mxu0 %v1980_v4 }
 0x17e   : > { %v3541_v56 = vpop.permute.xlu1 %977  ;;  %v3543_v62 = vpop.permute.xlu0 %981  ;;  %2633 = vmatpush3.msra.mxu0 %v1980_v4  ;;  %2743 = vmatprep.subr.mxu1 %v1982_v2 }
 0x17f   : > { %4722 = vst [vmem:[#allocation4_spill] sm:$0xff] %v3541_v56  ;;  %4723 = vst [vmem:[#allocation118_spill] sm:$0xff] %v3543_v62  ;;  %2759 = vmatpush3.msra.mxu1 %v1982_v2 }
 0x180   : > { %1361 = vperm.xlu0 %2779, %v4662_v61   ;;  %2744 = vmatprep.subr.mxu1 %v1981_v55 }
 0x181   : > { %1665 = vperm.xlu1 %2780, %v3016_v36   ;;  %2760 = vmatpush3.msra.mxu1 %v1981_v55  ;;  %v4750_v55 = vld [vmem:[#allocation2_spill] sm:$0xff] }
 0x182   : > { %v3547_v33 = vpop.permute.xlu1 %985  ;;  %v3549_v31 = vpop.permute.xlu0 %989  ;;  %2745 = vmatprep.subr.mxu1 %v1980_v4 }
 0x183   : > { %4724 = vst [vmem:[#allocation119_spill] sm:$0xff] %v3547_v33  ;;  %4725 = vst [vmem:[#allocation120_spill] sm:$0xff] %v3549_v31  ;;  %2761 = vmatpush3.msra.mxu1 %v1980_v4  ;;  %v2798_v31 = vld [vmem:[%s2874_s24 + $0xa0] sm:$0xff] }
 0x184   : > { %1369 = vperm.xlu0 %2779, %v4666_v58  }
 0x185   : > { %1669 = vperm.xlu1 %2780, %v3013_v35  }
 0x186   : > { %v3553_v53 = vpop.permute.xlu1 %993  ;;  %v3555_v62 = vpop.permute.xlu0 %997 }
 0x187   : > { %4726 = vst [vmem:[#allocation121_spill] sm:$0xff] %v3553_v53  ;;  %4727 = vst [vmem:[#allocation122_spill] sm:$0xff] %v3555_v62 }
 0x188   : > { %1377 = vperm.xlu0 %2779, %v4670_v60  }
 0x189   : > { %1673 = vperm.xlu1 %2780, %v3024_v38   ;;  %v4730_v38 = vmov 3  }
 0x18a   : > { %v3559_v36 = vpop.permute.xlu1 %1001  ;;  %v3561_v61 = vpop.permute.xlu0 %1005 }
 0x18b   : > { %4728 = vst [vmem:[#allocation123_spill] sm:$0xff] %v3559_v36  ;;  %4729 = vst [vmem:[#allocation124_spill] sm:$0xff] %v3561_v61 }
 0x18c   : > { %1385 = vperm.xlu0 %2779, %v4673_v57  }
 0x18d   : > { %1677 = vperm.xlu1 %2780, %v3021_v37  }
 0x18f   : > { %v3565_v35 = vpop.permute.xlu1 %1141  ;;  %v3567_v58 = vpop.permute.xlu0 %1145 }
 0x190   : > { %1393 = vperm.xlu0 %2779, %v3125_v63  }
 0x191   : > { %1681 = vperm.xlu1 %2780, %v3032_v40  }
 0x193   : > { %v3571_v60 = vpop.permute.xlu1 %1149  ;;  %v3573_v32 = vpop.permute.xlu0 %1157 }
 0x194   : > { %2796 = vset.pattern.permute.xlu0 %v4730_v38 }
 0x195   : > { %1685 = vperm.xlu1 %2780, %v3029_v39   ;;  %1657 = vperm.xlu0 %2796, %v3008_v34  }
 0x197   : > { %v3578_v57 = vpop.permute.xlu1 %1153  ;;  %v3580_v37 = vpop.permute.xlu0 %1165 }
 0x198   : > { %4731 = vst [vmem:[#allocation125_spill] sm:$0xff] %v3580_v37 }
 0x199   : > { %1689 = vperm.xlu1 %2780, %v3040_v42   ;;  %1537 = vperm.xlu0 %2796, %v2877_v1  }
 0x19b   : > { %v3584_v63 = vpop.permute.xlu1 %1161  ;;  %v3586_v40 = vpop.permute.xlu0 %1173 }
 0x19c   : > { %4732 = vst [vmem:[#allocation126_spill] sm:$0xff] %v3586_v40 }
 0x19d   : > { %1693 = vperm.xlu1 %2780, %v3037_v41   ;;  %1541 = vperm.xlu0 %2796, %v2885_v3  }
 0x19f   : > { %v3590_v2 = vpop.permute.xlu1 %1169  ;;  %v3592_v39 = vpop.permute.xlu0 %1181 }
 0x1a0   : > { %4733 = vst [vmem:[#allocation127_spill] sm:$0xff] %v3590_v2  ;;  %4734 = vst [vmem:[#allocation128_spill] sm:$0xff] %v3592_v39  ;;  %v4808_v2 = vld [vmem:[#allocation72_spill] sm:$0xff] }
 0x1a1   : > { %1697 = vperm.xlu1 %2780, %v3048_v44   ;;  %1545 = vperm.xlu0 %2796, %v2896_v6  }
 0x1a3   : > { %v3596_v34 = vpop.permute.xlu1 %1177  ;;  %v3598_v42 = vpop.permute.xlu0 %1189 }
 0x1a4   : > { %4735 = vst [vmem:[#allocation129_spill] sm:$0xff] %v3596_v34  ;;  %4736 = vst [vmem:[#allocation130_spill] sm:$0xff] %v3598_v42  ;;  %v4801_v34 = vld [vmem:[#allocation54_spill] sm:$0xff] }
 0x1a5   : > { %1701 = vperm.xlu1 %2780, %v3045_v43   ;;  %1549 = vperm.xlu0 %2796, %v2893_v5  }
 0x1a7   : > { %v3602_v1 = vpop.permute.xlu1 %1185  ;;  %v3604_v41 = vpop.permute.xlu0 %1197 }
 0x1a8   : > { %4737 = vst [vmem:[#allocation131_spill] sm:$0xff] %v3602_v1  ;;  %4738 = vst [vmem:[#allocation132_spill] sm:$0xff] %v3604_v41  ;;  %v4793_v41 = vld [vmem:[#allocation50_spill] sm:$0xff] }
 0x1a9   : > { %1705 = vperm.xlu1 %2780, %v3056_v46   ;;  %1553 = vperm.xlu0 %2796, %v2904_v8  }
 0x1ab   : > { %v3608_v3 = vpop.permute.xlu1 %1193  ;;  %v3610_v44 = vpop.permute.xlu0 %1205 }
 0x1ac   : > { %4739 = vst [vmem:[#allocation133_spill] sm:$0xff] %v3608_v3  ;;  %4740 = vst [vmem:[#allocation134_spill] sm:$0xff] %v3610_v44  ;;  %v4787_v44 = vld [vmem:[#allocation47_spill] sm:$0xff] }
 0x1ad   : > { %1709 = vperm.xlu1 %2780, %v3053_v45   ;;  %1557 = vperm.xlu0 %2796, %v2901_v7  }
 0x1af   : > { %v3614_v6 = vpop.permute.xlu1 %1201  ;;  %v3616_v43 = vpop.permute.xlu0 %1213 }
 0x1b0   : > { %4741 = vst [vmem:[#allocation135_spill] sm:$0xff] %v3614_v6  ;;  %4742 = vst [vmem:[#allocation136_spill] sm:$0xff] %v3616_v43  ;;  %v4785_v6 = vld [vmem:[#allocation46_spill] sm:$0xff] }
 0x1b1   : > { %1585 = vperm.xlu1 %2780, %v2936_v16   ;;  %1561 = vperm.xlu0 %2796, %v2912_v10   ;;  %v4749_v10 = vmov 2  }
 0x1b3   : > { %v3620_v5 = vpop.permute.xlu1 %1209  ;;  %v3622_v46 = vpop.permute.xlu0 %1221 }
 0x1b4   : > { %4743 = vst [vmem:[#allocation137_spill] sm:$0xff] %v3620_v5  ;;  %4744 = vst [vmem:[#allocation138_spill] sm:$0xff] %v3622_v46 }
 0x1b5   : > { %1713 = vperm.xlu1 %2780, %v3064_v48   ;;  %1565 = vperm.xlu0 %2796, %v2909_v9  }
 0x1b7   : > { %v3626_v8 = vpop.permute.xlu1 %1217  ;;  %v3628_v45 = vpop.permute.xlu0 %1229 }
 0x1b8   : > { %4745 = vst [vmem:[#allocation139_spill] sm:$0xff] %v3626_v8  ;;  %4746 = vst [vmem:[#allocation140_spill] sm:$0xff] %v3628_v45  ;;  %v3729_v45 = vld [vmem:[%s4562_s2] ss:$0 sm:$0xff] }
 0x1b9   : > { %1717 = vperm.xlu1 %2780, %v3061_v47   ;;  %1569 = vperm.xlu0 %2796, %v2920_v12   ;;  %4769 = vst [vmem:[#allocation154_spill] sm:$0xff] %v3729_v45 }
 0x1bb   : > { %v3632_v7 = vpop.permute.xlu1 %1225  ;;  %v3634_v16 = vpop.permute.xlu0 %1237 }
 0x1bc   : > { %4747 = vst [vmem:[#allocation141_spill] sm:$0xff] %v3632_v7  ;;  %4748 = vst [vmem:[#allocation142_spill] sm:$0xff] %v3634_v16 }
 0x1bd   : > { %2781 = vset.pattern.permute.xlu1 %v4749_v10  ;;  %1573 = vperm.xlu0 %2796, %v2917_v11  }
 0x1be   : > { %1333 = vperm.xlu1 %2781, %v4750_v55  }
 0x1bf   : > { %v3639_v48 = vpop.permute.xlu1 %1233  ;;  %v3641_v9 = vpop.permute.xlu0 %1245 }
 0x1c0   : > { %4751 = vst [vmem:[#allocation2_spill] sm:$0xff] %v3639_v48  ;;  %4752 = vst [vmem:[#allocation143_spill] sm:$0xff] %v3641_v9 }
 0x1c1   : > { %1577 = vperm.xlu0 %2796, %v2928_v14  }
 0x1c2   : > { %2782 = vset.pattern.permute.xlu1 %v4730_v38 }
 0x1c3   : > { %1593 = vperm.xlu1 %2782, %v2944_v18   ;;  %v3646_v12 = vpop.permute.xlu1 %1241  ;;  %v3648_v47 = vpop.permute.xlu0 %1253 }
 0x1c4   : > { %4753 = vst [vmem:[#allocation144_spill] sm:$0xff] %v3646_v12  ;;  %4754 = vst [vmem:[#allocation145_spill] sm:$0xff] %v3648_v47  ;;  %v2799_v12 = vld [vmem:[%s2874_s24 + $0xf8] sm:$0xff] }
 0x1c5   : > { %1581 = vperm.xlu0 %2796, %v2925_v13  }
 0x1c7   : > { %1721 = vperm.xlu1 %2782, %v4750_v55   ;;  %v3652_v11 = vpop.permute.xlu1 %1249  ;;  %v3654_v4 = vpop.permute.xlu0 %1261  ;;  %v4759_v55 = vld [vmem:[#allocation3_spill] sm:$0xff] }
 0x1c8   : > { %4755 = vst [vmem:[#allocation146_spill] sm:$0xff] %v3652_v11  ;;  %4756 = vst [vmem:[#allocation147_spill] sm:$0xff] %v3654_v4  ;;  %v614_v4 = vlaneseq  ;;  %v4766_v11 = vld [vmem:[#allocation14_spill] sm:$0xff] }
 0x1c9   : > { %1589 = vperm.xlu0 %2796, %v2933_v15  }
 0x1cb   : > { %1725 = vperm.xlu1 %2782, %v3069_v49   ;;  %v3658_v14 = vpop.permute.xlu1 %1257  ;;  %v3660_v61 = vpop.permute.xlu0 %1269 }
 0x1cc   : > { %4757 = vst [vmem:[#allocation148_spill] sm:$0xff] %v3658_v14 }
 0x1cd   : > { %1597 = vperm.xlu0 %2796, %v2941_v17  }
 0x1cf   : > { %2783 = vset.pattern.permute.xlu1 %v4749_v10  ;;  %v3664_v18 = vpop.permute.xlu1 %1265  ;;  %v3666_v13 = vpop.permute.xlu0 %1277 }
 0x1d0   : > { %4758 = vst [vmem:[#allocation149_spill] sm:$0xff] %v3664_v18  ;;  %1341 = vperm.xlu1 %2783, %v4759_v55  }
 0x1d1   : > { %1605 = vperm.xlu0 %2796, %v2949_v19  }
 0x1d3   : > { %v3670_v36 = vpop.permute.xlu1 %1273  ;;  %v3672_v15 = vpop.permute.xlu0 %1285 }
 0x1d4   : > { %2784 = vset.pattern.permute.xlu1 %v4730_v38 }
 0x1d5   : > { %1601 = vperm.xlu1 %2784, %v2952_v20   ;;  %1613 = vperm.xlu0 %2796, %v2957_v21   ;;  %v615_v20 = vshrl.u32 %v614_v4, 7 }
 0x1d7   : > { %v3677_v17 = vpop.permute.xlu1 %1281  ;;  %v3679_v49 = vpop.permute.xlu0 %1293  ;;  %v1010_v53 = vsub.s32 1, %v615_v20  ;;  %v1398_v4 = vsub.s32 2, %v615_v20 }
 0x1d9   : > { %1729 = vperm.xlu1 %2784, %v4759_v55   ;;  %1621 = vperm.xlu0 %2796, %v2965_v23   ;;  %v4761_v23 = vld [vmem:[#allocation5_spill] sm:$0xff]  ;;  %v616_v55 = vsub.s32 0, %v615_v20 }
 0x1db   : > { %v3683_v19 = vpop.permute.xlu1 %1289  ;;  %v3685_v18 = vpop.permute.xlu0 %1301 }
 0x1dd   : > { %1733 = vperm.xlu1 %2784, %v3077_v51   ;;  %1629 = vperm.xlu0 %2796, %v2973_v25   ;;  %v292_v25 = vld [vmem:[%s4561_s1] sm:$0xf] }
 0x1de   : > { %v3705_v14 = vrot.slane %v292_v25, %v616_v55  ;;  %v3716_v16 = vrot.slane %v292_v25, %v1398_v4  ;;  %v4770_v4 = vld [vmem:[#allocation16_spill] sm:$0xff] }
 0x1df   : > { %v3689_v21 = vpop.permute.xlu1 %1297  ;;  %v3691_v62 = vpop.permute.xlu0 %1309 }
 0x1e0   : > { %4760 = vst [vmem:[#allocation3_spill] sm:$0xff] %v3691_v62  ;;  %4763 = vst [vmem:[#allocation150_spill] sm:$0xff] %v3705_v14  ;;  %v618_v56 = vmul.f32 %v3705_v14, %v4766_v11 }
 0x1e1   : > { %2785 = vset.pattern.permute.xlu1 %v4749_v10  ;;  %1637 = vperm.xlu0 %2796, %v2981_v27   ;;  %v3707_v27 = vrot.slane %v292_v25, %v1010_v53 }
 0x1e2   : > { %1349 = vperm.xlu1 %2785, %v4761_v23   ;;  %v688_v11 = vadd.f32 %v3729_v45, %v618_v56  ;;  %v1401_v56 = vmul.f32 %v3716_v16, %v3567_v58 }
 0x1e3   : > { %v3696_v47 = vpop.permute.xlu1 %1305  ;;  %v3698_v51 = vpop.permute.xlu0 %1317  ;;  %v1012_v55 = vmul.f32 %v3707_v27, %v3324_v50 }
 0x1e4   : > { %4762 = vst [vmem:[#allocation5_spill] sm:$0xff] %v3698_v51  ;;  %v4810_v51 = vld [vmem:[#allocation74_spill] sm:$0xff] }
 0x1e5   : > { %1645 = vperm.xlu0 %2796, %v2989_v29   ;;  %v1786_v29 = vsub.s32 3, %v615_v20  ;;  %v1400_v20 = vmul.f32 %v3716_v16, %v3565_v35  ;;  %v1076_v48 = vadd.f32 %v1012_v55, %v688_v11 }
 0x1e6   : > { %2786 = vset.pattern.permute.xlu1 %v4730_v38 }
 0x1e7   : > { %1609 = vperm.xlu1 %2786, %v2798_v31   ;;  %v3710_v33 = vpop.permute.xlu1 %1313  ;;  %v3712_v9 = vpop.permute.xlu0 %1325  ;;  %v3736_v50 = vrot.slane %v292_v25, %v1786_v29  ;;  %v1464_v8 = vadd.f32 %v1400_v20, %v1076_v48  ;;  %v4773_v29 = vld [vmem:[#allocation7_spill] sm:$0xff] }
 0x1e8   : > { %4764 = vst [vmem:[#allocation151_spill] sm:$0xff] %v3710_v33  ;;  %4765 = vst [vmem:[#allocation152_spill] sm:$0xff] %v3712_v9  ;;  %v4776_v20 = vld [vmem:[#allocation15_spill] sm:$0xff]  ;;  %v4800_v9 = vld [vmem:[#allocation53_spill] sm:$0xff] }
 0x1e9   : > { %1653 = vperm.xlu0 %2796, %v2799_v12   ;;  %v619_v12 = vmul.f32 %v3705_v14, %v4770_v4  ;;  %v2803_v33 = vld [vmem:[%s2874_s24 + $0x1c0] sm:$0xff] }
 0x1eb   : > { %1737 = vperm.xlu1 %2786, %v4761_v23   ;;  %v3722_v53 = vpop.permute.xlu1 %1321  ;;  %v3724_v31 = vpop.permute.xlu0 %1329  ;;  %v1013_v23 = vmul.f32 %v3707_v27, %v3322_v52  ;;  %v689_v43 = vadd.f32 %v3729_v45, %v619_v12 }
 0x1ec   : > { %4767 = vst [vmem:[#allocation14_spill] sm:$0xff] %v3722_v53  ;;  %4768 = vst [vmem:[#allocation153_spill] sm:$0xff] %v3724_v31  ;;  %v4799_v31 = vld [vmem:[#allocation52_spill] sm:$0xff] }
 0x1ed   : > { %v1077_v35 = vadd.f32 %v1013_v23, %v689_v43  ;;  %v656_v39 = vmul.f32 %v3705_v14, %v4799_v31  ;;  %v4803_v31 = vld [vmem:[#allocation56_spill] sm:$0xff] }
 0x1ef   : > { %1741 = vperm.xlu1 %2786, %v4721_v0   ;;  %v3741_v46 = vpop.permute.xlu0 %1337  ;;  %v1465_v55 = vadd.f32 %v1401_v56, %v1077_v35  ;;  %v2800_v56 = vld [vmem:[%s2874_s24 + $0xb0] sm:$0xff]  ;;  %v726_v53 = vadd.f32 %v3729_v45, %v656_v39 }
 0x1f0   : > { %4771 = vst [vmem:[#allocation16_spill] sm:$0xff] %v3741_v46  ;;  %v1530_v7 = vpop.permute.xlu1 %1529  ;;  %v2801_v46 = vld [vmem:[%s2874_s24 + $0x1b0] sm:$0xff] }
 0x1f1   : > { %v1788_v4 = vmul.f32 %v3736_v50, %v1530_v7  ;;  %v4775_v7 = vld [vmem:[#allocation13_spill] sm:$0xff] }
 0x1f2   : > { %v620_v48 = vmul.f32 %v3705_v14, %v4775_v7 }
 0x1f3   : > { %2787 = vset.pattern.permute.xlu1 %v4749_v10  ;;  %v3748_v25 = vpop.permute.xlu0 %1345  ;;  %v1852_v52 = vadd.f32 %v1788_v4, %v1464_v8  ;;  %v621_v8 = vmul.f32 %v3705_v14, %v4776_v20  ;;  %v4777_v4 = vld [vmem:[#allocation17_spill] sm:$0xff]  ;;  %v4783_v20 = vld [vmem:[#allocation22_spill] sm:$0xff] }
 0x1f4   : > { %4772 = vst [vmem:[#allocation155_spill] sm:$0xff] %v3748_v25  ;;  %1357 = vperm.xlu1 %2787, %v4773_v29   ;;  %v1534_v0 = vpop.permute.xlu1 %1533  ;;  %v623_v35 = vmul.f32 %v3705_v14, %v4777_v4  ;;  %v690_v4 = vadd.f32 %v3729_v45, %v620_v48 }
 0x1f5   : > { %v1789_v11 = vmul.f32 %v3736_v50, %v1534_v0  ;;  %v1916_v12 = vmax.f32 %v1852_v52, 0.0  ;;  %v4778_v52 = vld [vmem:[#allocation18_spill] sm:$0xff]  ;;  %v4779_v0 = vld [vmem:[#allocation19_spill] sm:$0xff] }
 0x1f6   : > { %v622_v29 = vmul.f32 %v3705_v14, %v4778_v52  ;;  %v691_v52 = vadd.f32 %v3729_v45, %v621_v8  ;;  %v653_v8 = vmul.f32 %v3705_v14, %v4787_v44  ;;  %v4794_v44 = vld [vmem:[#allocation23_spill] sm:$0xff] }
 0x1f7   : > { %v1853_v5 = vadd.f32 %v1789_v11, %v1465_v55  ;;  %2634 = vmatprep.mubr.f32.mxu0 %v1916_v12  ;;  %v3752_v58 = vpop.permute.xlu0 %1353  ;;  %v625_v55 = vmul.f32 %v3705_v14, %v4779_v0  ;;  %v4780_v11 = vld [vmem:[#allocation20_spill] sm:$0xff]  ;;  %v693_v0 = vadd.f32 %v3729_v45, %v623_v35  ;;  %v3811_v1 = vmul.f32 %v3705_v14, %v4794_v44 }
 0x1f8   : > { %4774 = vst [vmem:[#allocation7_spill] sm:$0xff] %v3752_v58  ;;  %2788 = vset.pattern.permute.xlu1 %v4730_v38  ;;  %v3755_v43 = vpop.permute.xlu1 %1661  ;;  %v624_v12 = vmul.f32 %v3705_v14, %v4780_v11  ;;  %v4782_v58 = vld [vmem:[#allocation21_spill] sm:$0xff]  ;;  %v659_v44 = vmul.f32 %v3705_v14, %v4800_v9 }
 0x1f9   : > { %v1917_v23 = vmax.f32 %v1853_v5, 0.0  ;;  %1617 = vperm.xlu1 %2788, %v2800_v56   ;;  %v627_v5 = vmul.f32 %v3705_v14, %v4782_v58  ;;  %v626_v56 = vmul.f32 %v3705_v14, %v4783_v20  ;;  %v4784_v11 = vld [vmem:[#allocation45_spill] sm:$0xff]  ;;  %v650_v58 = vmul.f32 %v3705_v14, %v4785_v6  ;;  %4795 = vst [vmem:[#allocation20_spill] sm:$0xff] %v3811_v1 }
 0x1fa   : > { %v3788_v20 = vadd.f32 %v3729_v45, %v625_v55  ;;  %v694_v48 = vadd.f32 %v3729_v45, %v624_v12  ;;  %v4792_v6 = vld [vmem:[#allocation49_spill] sm:$0xff]  ;;  %v654_v12 = vmul.f32 %v3705_v14, %v4793_v41 }
 0x1fb   : > { %2635 = vmatmul.mubr.f32.vlgmr.msra.gmra.mxu0 %v1917_v23  ;;  %v3770_v7 = vpop.permute.xlu0 %1361  ;;  %v692_v23 = vadd.f32 %v3729_v45, %v622_v29  ;;  %v3798_v29 = vadd.f32 %v3729_v45, %v627_v5  ;;  %v655_v55 = vmul.f32 %v3705_v14, %v4792_v6  ;;  %v4798_v5 = vld [vmem:[#allocation51_spill] sm:$0xff]  ;;  %v2802_v6 = vld [vmem:[%s2874_s24 + $0x1b8] sm:$0xff] }
 0x1fc   : > { %4781 = vst [vmem:[#allocation13_spill] sm:$0xff] %v3770_v7  ;;  %v3776_v25 = vpop.permute.xlu1 %1665  ;;  %v651_v7 = vmul.f32 %v3705_v14, %v4784_v11  ;;  %4786 = vst [vmem:[#allocation15_spill] sm:$0xff] %v3788_v20  ;;  %v3801_v11 = vadd.f32 %v3729_v45, %v626_v56  ;;  %v657_v56 = vmul.f32 %v3705_v14, %v4798_v5  ;;  %v4802_v5 = vld [vmem:[#allocation55_spill] sm:$0xff]  ;;  %v4805_v1 = vld [vmem:[#allocation57_spill] sm:$0xff] }
 0x1fd   : > { %1745 = vperm.xlu1 %2788, %v2801_v46   ;;  %v4788_v46 = vld [vmem:[#allocation48_spill] sm:$0xff]  ;;  %4790 = vst [vmem:[#allocation18_spill] sm:$0xff] %v3798_v29  ;;  %v720_v29 = vadd.f32 %v3729_v45, %v650_v58  ;;  %v661_v40 = vmul.f32 %v3705_v14, %v4802_v5  ;;  %v725_v58 = vadd.f32 %v3729_v45, %v655_v55  ;;  %v4806_v20 = vld [vmem:[#allocation58_spill] sm:$0xff] }
 0x1fe   : > { %v652_v35 = vmul.f32 %v3705_v14, %v4788_v46  ;;  %4791 = vst [vmem:[#allocation19_spill] sm:$0xff] %v3801_v11  ;;  %v4796_v46 = vld [vmem:[#allocation24_spill] sm:$0xff]  ;;  %v721_v41 = vadd.f32 %v3729_v45, %v651_v7  ;;  %v658_v11 = vmul.f32 %v3705_v14, %v4801_v34  ;;  %v724_v9 = vadd.f32 %v3729_v45, %v654_v12 }
 0x1ff   : > { %v3795_v3 = vpop.permute.xlu0 %1369  ;;  %v663_v34 = vmul.f32 %v3705_v14, %v4805_v1  ;;  %v727_v5 = vadd.f32 %v3729_v45, %v657_v56  ;;  %v729_v12 = vadd.f32 %v3729_v45, %v659_v44  ;;  %v731_v39 = vadd.f32 %v3729_v45, %v661_v40 }
 0x200   : > { %4789 = vst [vmem:[#allocation17_spill] sm:$0xff] %v3795_v3  ;;  %v3807_v42 = vpop.permute.xlu1 %1669  ;;  %v3815_v3 = vmul.f32 %v3705_v14, %v4796_v46  ;;  %v723_v46 = vadd.f32 %v3729_v45, %v653_v8  ;;  %v662_v8 = vmul.f32 %v3705_v14, %v4806_v20  ;;  %v728_v1 = vadd.f32 %v3729_v45, %v658_v11 }
 0x201   : > { %1749 = vperm.xlu1 %2788, %v2802_v6   ;;  %v660_v6 = vmul.f32 %v3705_v14, %v4803_v31  ;;  %v1014_v31 = vmul.f32 %v3707_v27, %v3328_v59  ;;  %v1016_v20 = vmul.f32 %v3707_v27, %v4808_v2  ;;  %v4809_v14 = vld [vmem:[#allocation73_spill] sm:$0xff]  ;;  %v1044_v44 = vmul.f32 %v3707_v27, %v3420_v26 }
 0x202   : > { %4797 = vst [vmem:[#allocation21_spill] sm:$0xff] %v3815_v3  ;;  %v722_v3 = vadd.f32 %v3729_v45, %v652_v35  ;;  %v1017_v56 = vmul.f32 %v3707_v27, %v4809_v14  ;;  %v3867_v11 = vadd.f32 %v3729_v45, %v663_v34  ;;  %v3870_v2 = vadd.f32 %v3729_v45, %v662_v8 }
 0x203   : > { %v3834_v7 = vpop.permute.xlu0 %1377  ;;  %v730_v59 = vadd.f32 %v3729_v45, %v660_v6  ;;  %v1045_v14 = vmul.f32 %v3707_v27, %v3422_v54  ;;  %v1046_v40 = vmul.f32 %v3707_v27, %v3426_v28  ;;  %v1047_v26 = vmul.f32 %v3707_v27, %v3428_v22  ;;  %v4813_v54 = vld [vmem:[#allocation75_spill] sm:$0xff]  ;;  %v4814_v22 = vld [vmem:[#allocation100_spill] sm:$0xff] }
 0x204   : > { %4804 = vst [vmem:[#allocation22_spill] sm:$0xff] %v3834_v7  ;;  %v3842_v35 = vpop.permute.xlu1 %1673  ;;  %v4807_v7 = vld [vmem:[#allocation12_spill] sm:$0xff]  ;;  %4812 = vst [vmem:[#allocation46_spill] sm:$0xff] %v3867_v11  ;;  %v1048_v34 = vmul.f32 %v3707_v27, %v3432_v30  ;;  %v3884_v8 = vadd.f32 %v1016_v20, %v692_v23  ;;  %v3890_v45 = vmul.f32 %v3707_v27, %v4813_v54  ;;  %v4815_v30 = vld [vmem:[#allocation101_spill] sm:$0xff] }
 0x205   : > { %v1015_v55 = vmul.f32 %v3707_v27, %v4807_v7  ;;  %2789 = vset.pattern.permute.xlu1 %v4749_v10  ;;  %v1018_v7 = vmul.f32 %v3707_v27, %v4810_v51  ;;  %v1078_v51 = vadd.f32 %v1014_v31, %v690_v4  ;;  %v1049_v28 = vmul.f32 %v3707_v27, %v3434_v24  ;;  %v4816_v54 = vld [vmem:[#allocation102_spill] sm:$0xff]  ;;  %v4817_v11 = vld [vmem:[#allocation103_spill] sm:$0xff] }
 0x206   : > { %1365 = vperm.xlu1 %2789, %v2803_v33   ;;  %v1050_v31 = vmul.f32 %v3707_v27, %v4814_v22  ;;  %v1051_v23 = vmul.f32 %v3707_v27, %v4815_v30  ;;  %v1109_v20 = vadd.f32 %v1045_v14, %v721_v41  ;;  %v1052_v24 = vmul.f32 %v3707_v27, %v4816_v54 }
 0x207   : > { %v3864_v37 = vpop.permute.xlu0 %1385  ;;  %v3878_v62 = vadd.f32 %v1015_v55, %v691_v52  ;;  %v3895_v4 = vadd.f32 %v1018_v7, %v694_v48  ;;  %v1108_v52 = vadd.f32 %v1044_v44, %v720_v29  ;;  %v1433_v48 = vmul.f32 %v3716_v16, %v3670_v36 }
 0x208   : > { %4811 = vst [vmem:[#allocation45_spill] sm:$0xff] %v3864_v37  ;;  %v3876_v6 = vpop.permute.xlu1 %1677  ;;  %v3886_v37 = vadd.f32 %v1017_v56, %v693_v0  ;;  %v2804_v0 = vld [vmem:[%s2874_s24 + $0xc0] sm:$0xff]  ;;  %v1110_v56 = vadd.f32 %v1046_v40, %v722_v3  ;;  %v1111_v29 = vadd.f32 %v1047_v26, %v723_v46  ;;  %v1112_v44 = vadd.f32 %v1048_v34, %v724_v9  ;;  %v4818_v3 = vld [vmem:[#allocation104_spill] sm:$0xff]  ;;  %v4819_v46 = vld [vmem:[#allocation105_spill] sm:$0xff] }
 0x209   : > { %v1432_v22 = vmul.f32 %v3716_v16, %v3660_v61  ;;  %v1434_v30 = vmul.f32 %v3716_v16, %v3666_v13  ;;  %v1053_v41 = vmul.f32 %v3707_v27, %v4817_v11  ;;  %v1054_v14 = vmul.f32 %v3707_v27, %v4818_v3 }
 0x20a   : > { %2790 = vset.pattern.permute.xlu1 %v4730_v38  ;;  %v1821_v40 = vmul.f32 %v3736_v50, %v3755_v43  ;;  %v1114_v36 = vadd.f32 %v1050_v31, %v726_v53  ;;  %v3918_v54 = vadd.f32 %v1051_v23, %v727_v5  ;;  %v1055_v9 = vmul.f32 %v3707_v27, %v4819_v46 }
 0x20b   : > { %1625 = vperm.xlu1 %2790, %v2804_v0   ;;  %v3902_v55 = vpop.permute.xlu0 %1393  ;;  %v1113_v0 = vadd.f32 %v1049_v28, %v725_v58  ;;  %v1822_v61 = vmul.f32 %v3736_v50, %v3776_v25  ;;  %v3924_v13 = vadd.f32 %v1052_v24, %v728_v1  ;;  %v1402_v58 = vmul.f32 %v3716_v16, %v3571_v60 }
 0x20c   : > { %v1682_v7 = vpop.permute.xlu1 %1681  ;;  %v1497_v11 = vadd.f32 %v1433_v48, %v1109_v20  ;;  %v1435_v43 = vmul.f32 %v3716_v16, %v3677_v17  ;;  %v1498_v26 = vadd.f32 %v1434_v30, %v1110_v56  ;;  %v1436_v34 = vmul.f32 %v3716_v16, %v3672_v15  ;;  %v2805_v56 = vld [vmem:[%s2874_s24 + $0x1c8] sm:$0xff] }
 0x20d   : > { %v1496_v25 = vadd.f32 %v1432_v22, %v1108_v52  ;;  %v3935_v1 = vadd.f32 %v1054_v14, %v730_v59  ;;  %v1823_v60 = vmul.f32 %v3736_v50, %v3807_v42  ;;  %v3939_v23 = vadd.f32 %v1055_v9, %v731_v39 }
 0x20e   : > { %v1885_v31 = vadd.f32 %v1821_v40, %v1497_v11  ;;  %v1886_v17 = vadd.f32 %v1822_v61, %v1498_v26  ;;  %v1824_v20 = vmul.f32 %v3736_v50, %v3842_v35  ;;  %v1466_v24 = vadd.f32 %v1402_v58, %v1078_v51 }
 0x20f   : > { %1753 = vperm.xlu1 %2790, %v2803_v33   ;;  %v3933_v33 = vadd.f32 %v1053_v41, %v729_v12  ;;  %v1403_v12 = vmul.f32 %v3716_v16, %v3578_v57  ;;  %v1499_v52 = vadd.f32 %v1435_v43, %v1111_v29  ;;  %v1437_v59 = vmul.f32 %v3716_v16, %v3683_v19 }
 0x210   : > { %v1686_v53 = vpop.permute.xlu1 %1685  ;;  %v1658_v5 = vpop.permute.xlu0 %1657  ;;  %v1500_v42 = vadd.f32 %v1436_v34, %v1112_v44  ;;  %v1438_v39 = vmul.f32 %v3716_v16, %v3679_v49  ;;  %v1404_v51 = vmul.f32 %v3716_v16, %v3573_v32  ;;  %v1949_v41 = vmax.f32 %v1885_v31, 0.0  ;;  %v2806_v32 = vld [vmem:[%s2874_s24 + $0x1d0] sm:$0xff] }
 0x211   : > { %v1820_v28 = vmul.f32 %v3736_v50, %v1658_v5  ;;  %v1887_v3 = vadd.f32 %v1823_v60, %v1499_v52  ;;  %v1825_v57 = vmul.f32 %v3736_v50, %v3876_v6  ;;  %v1950_v29 = vmax.f32 %v1886_v17, 0.0  ;;  %v4820_v60 = vld [vmem:[#allocation3_spill] sm:$0xff] }
 0x212   : > { %v1888_v19 = vadd.f32 %v1824_v20, %v1500_v42  ;;  %v1826_v14 = vmul.f32 %v3736_v50, %v1682_v7  ;;  %v1467_v49 = vadd.f32 %v1403_v12, %v3878_v62  ;;  %v1501_v40 = vadd.f32 %v1437_v59, %v1113_v0 }
 0x213   : > { %1757 = vperm.xlu1 %2790, %v2805_v56   ;;  %v1884_v15 = vadd.f32 %v1820_v28, %v1496_v25  ;;  %v1439_v46 = vmul.f32 %v3716_v16, %v3689_v21  ;;  %v1502_v6 = vadd.f32 %v1438_v39, %v1114_v36  ;;  %v1440_v58 = vmul.f32 %v3716_v16, %v3685_v18 }
 0x214   : > { %v1690_v48 = vpop.permute.xlu1 %1689  ;;  %v1538_v22 = vpop.permute.xlu0 %1537  ;;  %v1468_v43 = vadd.f32 %v1404_v51, %v3884_v8  ;;  %v1951_v62 = vmax.f32 %v1887_v3, 0.0  ;;  %v1889_v0 = vadd.f32 %v1825_v57, %v1501_v40  ;;  %v1827_v5 = vmul.f32 %v3736_v50, %v1686_v53  ;;  %v4824_v51 = vld [vmem:[#allocation151_spill] sm:$0xff] }
 0x215   : > { %v1790_v35 = vmul.f32 %v3736_v50, %v1538_v22  ;;  %v1948_v30 = vmax.f32 %v1884_v15, 0.0  ;;  %v1952_v21 = vmax.f32 %v1888_v19, 0.0  ;;  %v1890_v26 = vadd.f32 %v1826_v14, %v1502_v6  ;;  %v2807_v15 = vld [vmem:[%s2874_s24 + $0xd0] sm:$0xff]  ;;  %v4822_v22 = vld [vmem:[#allocation125_spill] sm:$0xff] }
 0x216   : > { %v1828_v34 = vmul.f32 %v3736_v50, %v1690_v48  ;;  %v1405_v18 = vmul.f32 %v3716_v16, %v3584_v63  ;;  %v1503_v36 = vadd.f32 %v1439_v46, %v3918_v54  ;;  %v1441_v25 = vmul.f32 %v3716_v16, %v3696_v47  ;;  %v4821_v63 = vld [vmem:[#allocation106_spill] sm:$0xff] }
 0x217   : > { %v1854_v44 = vadd.f32 %v1790_v35, %v1466_v24  ;;  %2791 = vset.pattern.permute.xlu1 %v4749_v10  ;;  %2682 = vmatprep.mubr.f32.mxu1 %v1948_v30  ;;  %v1504_v31 = vadd.f32 %v1440_v58, %v3924_v13  ;;  %v1442_v17 = vmul.f32 %v3716_v16, %v4820_v60  ;;  %v1953_v47 = vmax.f32 %v1889_v0, 0.0  ;;  %v4823_v35 = vld [vmem:[#allocation5_spill] sm:$0xff]  ;;  %v4827_v0 = vld [vmem:[#allocation14_spill] sm:$0xff] }
 0x218   : > { %1373 = vperm.xlu1 %2791, %v2806_v32   ;;  %v1694_v9 = vpop.permute.xlu1 %1693  ;;  %2683 = vmatmul.mubr.f32.vlgmr.msra.gmra.mxu1 %v1949_v41  ;;  %v1542_v61 = vpop.permute.xlu0 %1541  ;;  %v1056_v54 = vmul.f32 %v3707_v27, %v4821_v63  ;;  %v1891_v24 = vadd.f32 %v1827_v5, %v1503_v36  ;;  %v1954_v52 = vmax.f32 %v1890_v26, 0.0  ;;  %v1406_v42 = vmul.f32 %v3716_v16, %v4822_v22  ;;  %v4829_v36 = vld [vmem:[#allocation76_spill] sm:$0xff] }
 0x219   : > { %v1918_v7 = vmax.f32 %v1854_v44, 0.0  ;;  %v1791_v11 = vmul.f32 %v3736_v50, %v1542_v61  ;;  %2685 = vmatprep.mubr.f32.mxu1 %v1950_v29  ;;  %v1829_v12 = vmul.f32 %v3736_v50, %v1694_v9  ;;  %v1892_v59 = vadd.f32 %v1828_v34, %v1504_v31  ;;  %v4825_v9 = vld [vmem:[#allocation107_spill] sm:$0xff] }
 0x21a   : > { %v1505_v39 = vadd.f32 %v1441_v25, %v3933_v33  ;;  %v1444_v30 = vmul.f32 %v3716_v16, %v4823_v35  ;;  %v1443_v41 = vmul.f32 %v3716_v16, %v4824_v51  ;;  %v1469_v29 = vadd.f32 %v1405_v18, %v3886_v37  ;;  %v4836_v35 = vld [vmem:[#allocation21_spill] sm:$0xff]  ;;  %v4837_v51 = vld [vmem:[#allocation19_spill] sm:$0xff] }
 0x21b   : > { %v1855_v28 = vadd.f32 %v1791_v11, %v1467_v49  ;;  %2637 = vmatprep.mubr.f32.mxu0 %v1918_v7  ;;  %v1506_v19 = vadd.f32 %v1442_v17, %v3935_v1  ;;  %v1120_v33 = vadd.f32 %v1056_v54, %v3870_v2  ;;  %v1955_v49 = vmax.f32 %v1891_v24, 0.0  ;;  %v4826_v7 = vld [vmem:[#allocation127_spill] sm:$0xff]  ;;  %v4833_v54 = vld [vmem:[#allocation60_spill] sm:$0xff] }
 0x21c   : > { %2792 = vset.pattern.permute.xlu1 %v4730_v38  ;;  %v1698_v8 = vpop.permute.xlu1 %1697  ;;  %2686 = vmatmul.mubr.f32.gmra.mxu1 %v1951_v62  ;;  %v1546_v53 = vpop.permute.xlu0 %1545  ;;  %v1893_v40 = vadd.f32 %v1829_v12, %v1505_v39  ;;  %v1057_v61 = vmul.f32 %v3707_v27, %v4825_v9  ;;  %v1956_v6 = vmax.f32 %v1892_v59, 0.0  ;;  %v1470_v1 = vadd.f32 %v1406_v42, %v3895_v4  ;;  %v4828_v4 = vld [vmem:[#allocation15_spill] sm:$0xff]  ;;  %v4835_v12 = vld [vmem:[#allocation126_spill] sm:$0xff] }
 0x21d   : > { %v1919_v20 = vmax.f32 %v1855_v28, 0.0  ;;  %v1792_v56 = vmul.f32 %v3736_v50, %v1546_v53  ;;  %1633 = vperm.xlu1 %2792, %v2807_v15   ;;  %2688 = vmatprep.mubr.f32.mxu1 %v1952_v21  ;;  %v1830_v13 = vmul.f32 %v3736_v50, %v1698_v8  ;;  %v1508_v11 = vadd.f32 %v1444_v30, %v1120_v33  ;;  %v2808_v28 = vld [vmem:[%s2874_s24 + $0x1d8] sm:$0xff]  ;;  %v4830_v53 = vld [vmem:[#allocation46_spill] sm:$0xff] }
 0x21e   : > { %v1507_v2 = vadd.f32 %v1443_v41, %v3939_v23  ;;  %v1445_v5 = vmul.f32 %v3716_v16, %v4827_v0  ;;  %v1083_v18 = vadd.f32 %v3890_v45, %v4828_v4  ;;  %v1020_v23 = vmul.f32 %v3707_v27, %v4829_v36  ;;  %v4832_v15 = vld [vmem:[#allocation154_spill] sm:$0xff]  ;;  %v4843_v0 = vld [vmem:[#allocation25_spill] sm:$0xff] }
 0x21f   : > { %v1856_v48 = vadd.f32 %v1792_v56, %v1468_v43  ;;  %2638 = vmatmul.mubr.f32.gmra.mxu0 %v1919_v20  ;;  %v1894_v58 = vadd.f32 %v1830_v13, %v1506_v19  ;;  %v1957_v25 = vmax.f32 %v1893_v40, 0.0  ;;  %v1121_v31 = vadd.f32 %v1057_v61, %v4830_v53  ;;  %v4831_v56 = vld [vmem:[#allocation20_spill] sm:$0xff]  ;;  %v2809_v19 = vld [vmem:[%s2874_s24 + $0x1e0] sm:$0xff]  ;;  %v4846_v4 = vld [vmem:[#allocation109_spill] sm:$0xff] }
 0x220   : > { %v1702_v3 = vpop.permute.xlu1 %1701  ;;  %2689 = vmatmul.mubr.f32.gmra.mxu1 %v1953_v47  ;;  %v1550_v57 = vpop.permute.xlu0 %1549  ;;  %v4012_v63 = vadd.f32 %v4832_v15, %v4831_v56  ;;  %v4834_v47 = vld [vmem:[#allocation150_spill] sm:$0xff]  ;;  %v1408_v45 = vmul.f32 %v3716_v16, %v4835_v12  ;;  %v698_v30 = vadd.f32 %v4832_v15, %v4836_v35  ;;  %v1084_v41 = vadd.f32 %v1020_v23, %v4837_v51  ;;  %v4849_v56 = vld [vmem:[#allocation153_spill] sm:$0xff] }
 0x221   : > { %v1920_v14 = vmax.f32 %v1856_v48, 0.0  ;;  %v1793_v44 = vmul.f32 %v3736_v50, %v1550_v57  ;;  %1761 = vperm.xlu1 %2792, %v2806_v32   ;;  %2691 = vmatprep.mubr.f32.mxu1 %v1954_v52  ;;  %v1831_v46 = vmul.f32 %v3736_v50, %v1702_v3  ;;  %v1407_v32 = vmul.f32 %v3716_v16, %v4826_v7  ;;  %v4838_v3 = vld [vmem:[#allocation77_spill] sm:$0xff]  ;;  %v4847_v36 = vld [vmem:[#allocation26_spill] sm:$0xff] }
 0x222   : > { %v1958_v60 = vmax.f32 %v1894_v58, 0.0  ;;  %v664_v24 = vmul.f32 %v4834_v47, %v4833_v54  ;;  %v1509_v48 = vadd.f32 %v1445_v5, %v1121_v31  ;;  %v1021_v57 = vmul.f32 %v3707_v27, %v4838_v3  ;;  %v4841_v58 = vld [vmem:[#allocation129_spill] sm:$0xff]  ;;  %v2810_v53 = vld [vmem:[%s2874_s24 + $0xe0] sm:$0xff] }
 0x223   : > { %v1857_v37 = vadd.f32 %v1793_v44, %v1469_v29  ;;  %2640 = vmatprep.mubr.f32.mxu0 %v1920_v14  ;;  %v1895_v8 = vadd.f32 %v1831_v46, %v1507_v2  ;;  %v1471_v52 = vadd.f32 %v1407_v32, %v1083_v18  ;;  %v4839_v14 = vld [vmem:[#allocation108_spill] sm:$0xff]  ;;  %v4840_v46 = vld [vmem:[#allocation59_spill] sm:$0xff]  ;;  %v631_v5 = vmul.f32 %v4834_v47, %v4843_v0 }
 0x224   : > { %v1706_v43 = vpop.permute.xlu1 %1705  ;;  %2692 = vmatmul.mubr.f32.gmra.mxu1 %v1955_v49  ;;  %v1554_v62 = vpop.permute.xlu0 %1553  ;;  %v1058_v44 = vmul.f32 %v3707_v27, %v4839_v14  ;;  %v665_v9 = vmul.f32 %v4834_v47, %v4840_v46  ;;  %v734_v61 = vadd.f32 %v4832_v15, %v664_v24  ;;  %v4842_v32 = vld [vmem:[#allocation152_spill] sm:$0xff]  ;;  %v1059_v18 = vmul.f32 %v3707_v27, %v4846_v4 }
 0x225   : > { %v1921_v21 = vmax.f32 %v1857_v37, 0.0  ;;  %v1832_v26 = vmul.f32 %v3736_v50, %v1706_v43  ;;  %v1794_v34 = vmul.f32 %v3736_v50, %v1554_v62  ;;  %1765 = vperm.xlu1 %2792, %v2808_v28   ;;  %2694 = vmatprep.mubr.f32.mxu1 %v1956_v6  ;;  %v1959_v29 = vmax.f32 %v1895_v8, 0.0 }
 0x226   : > { %v1472_v6 = vadd.f32 %v1408_v45, %v1084_v41  ;;  %v1409_v37 = vmul.f32 %v3716_v16, %v4841_v58  ;;  %v630_v23 = vmul.f32 %v4834_v47, %v4847_v36  ;;  %v735_v31 = vadd.f32 %v4832_v15, %v665_v9 }
 0x227   : > { %v1896_v17 = vadd.f32 %v1832_v26, %v1508_v11  ;;  %v1858_v20 = vadd.f32 %v1794_v34, %v1470_v1  ;;  %2641 = vmatmul.mubr.f32.gmra.mxu0 %v1921_v21  ;;  %v1446_v11 = vmul.f32 %v3716_v16, %v4842_v32  ;;  %v4844_v21 = vld [vmem:[#allocation18_spill] sm:$0xff]  ;;  %v1447_v54 = vmul.f32 %v3716_v16, %v4849_v56  ;;  %v4860_v56 = vld [vmem:[#allocation81_spill] sm:$0xff] }
 0x228   : > { %v1710_v59 = vpop.permute.xlu1 %1709  ;;  %2695 = vmatmul.mubr.f32.gmra.mxu1 %v1957_v25  ;;  %v1558_v13 = vpop.permute.xlu0 %1557  ;;  %v1085_v26 = vadd.f32 %v1021_v57, %v4844_v21  ;;  %v4845_v34 = vld [vmem:[#allocation78_spill] sm:$0xff]  ;;  %v1122_v25 = vadd.f32 %v1058_v44, %v734_v61  ;;  %v1123_v51 = vadd.f32 %v1059_v18, %v735_v31  ;;  %v701_v41 = vadd.f32 %v4832_v15, %v631_v5  ;;  %v2811_v5 = vld [vmem:[%s2874_s24 + $0x1e8] sm:$0xff] }
 0x229   : > { %v1922_v22 = vmax.f32 %v1858_v20, 0.0  ;;  %v1833_v42 = vmul.f32 %v3736_v50, %v1710_v59  ;;  %v1795_v39 = vmul.f32 %v3736_v50, %v1558_v13  ;;  %2793 = vset.pattern.permute.xlu1 %v4749_v10  ;;  %2697 = vmatprep.mubr.f32.mxu1 %v1958_v60  ;;  %v1960_v33 = vmax.f32 %v1896_v17, 0.0  ;;  %v4848_v60 = vld [vmem:[#allocation128_spill] sm:$0xff]  ;;  %v4858_v18 = vld [vmem:[#allocation130_spill] sm:$0xff] }
 0x22a   : > { %1381 = vperm.xlu1 %2793, %v2809_v19   ;;  %v1022_v28 = vmul.f32 %v3707_v27, %v4845_v34  ;;  %v1410_v17 = vmul.f32 %v3716_v16, %v4848_v60  ;;  %v1473_v20 = vadd.f32 %v1409_v37, %v1085_v26  ;;  %v1510_v45 = vadd.f32 %v1446_v11, %v1122_v25  ;;  %v4856_v26 = vld [vmem:[#allocation29_spill] sm:$0xff] }
 0x22b   : > { %v1897_v49 = vadd.f32 %v1833_v42, %v1509_v48  ;;  %v1859_v40 = vadd.f32 %v1795_v39, %v1471_v52  ;;  %2643 = vmatprep.mubr.f32.mxu0 %v1922_v22  ;;  %v4850_v48 = vld [vmem:[#allocation27_spill] sm:$0xff]  ;;  %v635_v34 = vmul.f32 %v4834_v47, %v4856_v26  ;;  %v1412_v36 = vmul.f32 %v3716_v16, %v4858_v18  ;;  %v2813_v26 = vld [vmem:[%s2874_s24 + $0xf0] sm:$0xff] }
 0x22c   : > { %v4034_v1 = vpop.permute.xlu1 %1585  ;;  %2698 = vmatmul.mubr.f32.gmra.mxu1 %v1959_v29  ;;  %v1562_v7 = vpop.permute.xlu0 %1561  ;;  %v633_v22 = vmul.f32 %v4834_v47, %v4850_v48  ;;  %v1086_v42 = vadd.f32 %v1022_v28, %v698_v30  ;;  %v4851_v39 = vld [vmem:[#allocation79_spill] sm:$0xff]  ;;  %v4852_v29 = vld [vmem:[#allocation28_spill] sm:$0xff]  ;;  %v4857_v28 = vld [vmem:[#allocation61_spill] sm:$0xff] }
 0x22d   : > { %v1961_v2 = vmax.f32 %v1897_v49, 0.0  ;;  %v1923_v43 = vmax.f32 %v1859_v40, 0.0  ;;  %v1796_v62 = vmul.f32 %v3736_v50, %v1562_v7  ;;  %2700 = vmatprep.mubr.f32.mxu1 %v1960_v33  ;;  %v1023_v35 = vmul.f32 %v3707_v27, %v4851_v39  ;;  %v4853_v33 = vld [vmem:[#allocation131_spill] sm:$0xff]  ;;  %v4854_v7 = vld [vmem:[#allocation30_spill] sm:$0xff]  ;;  %v4864_v39 = vld [vmem:[#allocation132_spill] sm:$0xff] }
 0x22e   : > { %2794 = vset.pattern.permute.xlu1 %v4730_v38  ;;  %v632_v14 = vmul.f32 %v4834_v47, %v4852_v29  ;;  %v1474_v44 = vadd.f32 %v1410_v17, %v1086_v42  ;;  %v1411_v49 = vmul.f32 %v3716_v16, %v4853_v33  ;;  %v1511_v40 = vadd.f32 %v1447_v54, %v1123_v51  ;;  %v4859_v17 = vld [vmem:[#allocation62_spill] sm:$0xff]  ;;  %v2812_v51 = vld [vmem:[%s2874_s24 + $0x1f0] sm:$0xff]  ;;  %v4865_v29 = vld [vmem:[#allocation133_spill] sm:$0xff] }
 0x22f   : > { %v1860_v8 = vadd.f32 %v1796_v62, %v1472_v6  ;;  %1641 = vperm.xlu1 %2794, %v2810_v53   ;;  %2644 = vmatmul.mubr.f32.gmra.mxu0 %v1923_v43  ;;  %v703_v37 = vadd.f32 %v4832_v15, %v633_v22  ;;  %v634_v32 = vmul.f32 %v4834_v47, %v4854_v7  ;;  %v4863_v22 = vld [vmem:[#allocation110_spill] sm:$0xff]  ;;  %v4867_v7 = vld [vmem:[#allocation111_spill] sm:$0xff] }
 0x230   : > { %v1714_v24 = vpop.permute.xlu1 %1713  ;;  %2701 = vmatmul.mubr.f32.gmra.mxu1 %v1961_v2  ;;  %v1566_v12 = vpop.permute.xlu0 %1565  ;;  %v1087_v11 = vadd.f32 %v1023_v35, %v4012_v63  ;;  %v4855_v2 = vld [vmem:[#allocation80_spill] sm:$0xff]  ;;  %v702_v21 = vadd.f32 %v4832_v15, %v632_v14  ;;  %v667_v4 = vmul.f32 %v4834_v47, %v4857_v28  ;;  %v1025_v54 = vmul.f32 %v3707_v27, %v4860_v56 }
 0x231   : > { %v1924_v52 = vmax.f32 %v1860_v8, 0.0  ;;  %v1834_v59 = vmul.f32 %v3736_v50, %v1714_v24  ;;  %v1797_v13 = vmul.f32 %v3736_v50, %v1566_v12  ;;  %v1024_v43 = vmul.f32 %v3707_v27, %v4855_v2  ;;  %v4861_v24 = vld [vmem:[#allocation82_spill] sm:$0xff] }
 0x232   : > { %v704_v60 = vadd.f32 %v4832_v15, %v634_v32  ;;  %v1026_v12 = vmul.f32 %v3707_v27, %v4861_v24  ;;  %v737_v48 = vadd.f32 %v4832_v15, %v667_v4  ;;  %v1060_v42 = vmul.f32 %v3707_v27, %v4863_v22  ;;  %v4868_v2 = vld [vmem:[#allocation134_spill] sm:$0xff]  ;;  %v4870_v4 = vld [vmem:[#allocation85_spill] sm:$0xff] }
 0x233   : > { %v1898_v3 = vadd.f32 %v1834_v59, %v1510_v45  ;;  %v1861_v57 = vadd.f32 %v1797_v13, %v1473_v20  ;;  %1769 = vperm.xlu1 %2794, %v2809_v19   ;;  %2646 = vmatprep.mubr.f32.mxu0 %v1924_v52  ;;  %v700_v19 = vadd.f32 %v4832_v15, %v630_v23  ;;  %v4862_v52 = vld [vmem:[#allocation83_spill] sm:$0xff]  ;;  %v4872_v24 = vld [vmem:[#allocation137_spill] sm:$0xff] }
 0x234   : > { %v1718_v30 = vpop.permute.xlu1 %1717  ;;  %v1570_v46 = vpop.permute.xlu0 %1569  ;;  %v1475_v23 = vadd.f32 %v1411_v49, %v1087_v11  ;;  %v666_v20 = vmul.f32 %v4834_v47, %v4859_v17  ;;  %v1027_v59 = vmul.f32 %v3707_v27, %v4862_v52  ;;  %v1414_v35 = vmul.f32 %v3716_v16, %v4864_v39 }
 0x235   : > { %v1962_v9 = vmax.f32 %v1898_v3, 0.0  ;;  %v1925_v61 = vmax.f32 %v1861_v57, 0.0  ;;  %v1835_v6 = vmul.f32 %v3736_v50, %v1718_v30  ;;  %v1798_v58 = vmul.f32 %v3736_v50, %v1570_v46 }
 0x236   : > { %v1088_v45 = vadd.f32 %v1024_v43, %v700_v19  ;;  %v1413_v14 = vmul.f32 %v3716_v16, %v4865_v29  ;;  %v736_v33 = vadd.f32 %v4832_v15, %v666_v20  ;;  %v1090_v49 = vadd.f32 %v1026_v12, %v702_v21 }
 0x237   : > { %v1899_v62 = vadd.f32 %v1835_v6, %v1511_v40  ;;  %v1862_v0 = vadd.f32 %v1798_v58, %v1474_v44  ;;  %1773 = vperm.xlu1 %2794, %v2811_v5   ;;  %2647 = vmatmul.mubr.f32.gmra.mxu0 %v1925_v61  ;;  %v4866_v40 = vld [vmem:[#allocation84_spill] sm:$0xff]  ;;  %v1802_v46 = vmul.f32 %v3736_v50, %v4034_v1 }
 0x238   : > { %2703 = vmatprep.mubr.f32.mxu1 %v1962_v9  ;;  %v1574_v63 = vpop.permute.xlu0 %1573  ;;  %v1476_v57 = vadd.f32 %v1412_v36, %v1088_v45  ;;  %v1028_v30 = vmul.f32 %v3707_v27, %v4866_v40  ;;  %v1089_v61 = vadd.f32 %v1025_v54, %v701_v41  ;;  %v1091_v6 = vadd.f32 %v1027_v59, %v703_v37 }
 0x239   : > { %v1963_v25 = vmax.f32 %v1899_v62, 0.0  ;;  %v1926_v8 = vmax.f32 %v1862_v0, 0.0  ;;  %v1799_v53 = vmul.f32 %v3736_v50, %v1574_v63  ;;  %v1334_v31 = vpop.permute.xlu1 %1333  ;;  %v1061_v32 = vmul.f32 %v3707_v27, %v4867_v7  ;;  %v4869_v62 = vld [vmem:[#allocation135_spill] sm:$0xff] }
 0x23a   : > { %v1448_v58 = vmul.f32 %v3716_v16, %v1334_v31  ;;  %v1478_v11 = vadd.f32 %v1414_v35, %v1090_v49  ;;  %v1416_v43 = vmul.f32 %v3716_v16, %v4868_v2  ;;  %v1415_v0 = vmul.f32 %v3716_v16, %v4869_v62  ;;  %v4877_v2 = vld [vmem:[#allocation139_spill] sm:$0xff] }
 0x23b   : > { %v1863_v13 = vadd.f32 %v1799_v53, %v1475_v23  ;;  %2795 = vset.pattern.permute.xlu1 %v4749_v10  ;;  %2649 = vmatprep.mubr.f32.mxu0 %v1926_v8  ;;  %v1124_v5 = vadd.f32 %v1060_v42, %v736_v33  ;;  %v1477_v41 = vadd.f32 %v1413_v14, %v1089_v61  ;;  %v4874_v14 = vld [vmem:[#allocation32_spill] sm:$0xff] }
 0x23c   : > { %2704 = vmatmul.mubr.f32.gmra.mxu1 %v1963_v25  ;;  %1389 = vperm.xlu1 %2795, %v2812_v51   ;;  %v1578_v3 = vpop.permute.xlu0 %1577  ;;  %v1092_v28 = vadd.f32 %v1028_v30, %v704_v60  ;;  %v1029_v18 = vmul.f32 %v3707_v27, %v4870_v4  ;;  %v1866_v36 = vadd.f32 %v1802_v46, %v1478_v11  ;;  %v4871_v25 = vld [vmem:[#allocation16_spill] sm:$0xff]  ;;  %v2814_v30 = vld [vmem:[%s2874_s24 + $0x1f8] sm:$0xff]  ;;  %v4875_v46 = vld [vmem:[#allocation87_spill] sm:$0xff] }
 0x23d   : > { %v1927_v44 = vmax.f32 %v1863_v13, 0.0  ;;  %v1800_v10 = vmul.f32 %v3736_v50, %v1578_v3  ;;  %v1449_v8 = vmul.f32 %v3716_v16, %v4871_v25  ;;  %v705_v17 = vadd.f32 %v4832_v15, %v635_v34 }
 0x23e   : > { %v1594_v9 = vpop.permute.xlu1 %1593  ;;  %v1125_v20 = vadd.f32 %v1061_v32, %v737_v48  ;;  %v1480_v56 = vadd.f32 %v1416_v43, %v1092_v28  ;;  %v1479_v60 = vadd.f32 %v1415_v0, %v1091_v6  ;;  %v1417_v12 = vmul.f32 %v3716_v16, %v4872_v24  ;;  %v4876_v6 = vld [vmem:[#allocation86_spill] sm:$0xff] }
 0x23f   : > { %v1864_v19 = vadd.f32 %v1800_v10, %v1476_v57  ;;  %2650 = vmatmul.mubr.f32.gmra.mxu0 %v1927_v44  ;;  %v1804_v63 = vmul.f32 %v3736_v50, %v1594_v9  ;;  %v1093_v13 = vadd.f32 %v1029_v18, %v705_v17  ;;  %v1930_v22 = vmax.f32 %v1866_v36, 0.0  ;;  %v4873_v57 = vld [vmem:[#allocation31_spill] sm:$0xff]  ;;  %v4880_v18 = vld [vmem:[#allocation112_spill] sm:$0xff] }
 0x240   : > { %2797 = vset.pattern.permute.xlu1 %v4730_v38  ;;  %v1582_v1 = vpop.permute.xlu0 %1581  ;;  %v1512_v38 = vadd.f32 %v1448_v58, %v1124_v5  ;;  %v1513_v35 = vadd.f32 %v1449_v8, %v1125_v20  ;;  %v637_v29 = vmul.f32 %v4834_v47, %v4873_v57  ;;  %v636_v44 = vmul.f32 %v4834_v47, %v4874_v14  ;;  %v4884_v14 = vld [vmem:[#allocation33_spill] sm:$0xff] }
 0x241   : > { %v1928_v37 = vmax.f32 %v1864_v19, 0.0  ;;  %v1801_v21 = vmul.f32 %v3736_v50, %v1582_v1  ;;  %1649 = vperm.xlu1 %2797, %v2813_v26   ;;  %v1868_v42 = vadd.f32 %v1804_v63, %v1480_v56  ;;  %v1031_v9 = vmul.f32 %v3707_v27, %v4875_v46  ;;  %v4878_v1 = vld [vmem:[#allocation64_spill] sm:$0xff]  ;;  %v4881_v63 = vld [vmem:[#allocation63_spill] sm:$0xff] }
 0x242   : > { %v1722_v23 = vpop.permute.xlu1 %1721  ;;  %v1030_v58 = vmul.f32 %v3707_v27, %v4876_v6  ;;  %v707_v11 = vadd.f32 %v4832_v15, %v637_v29  ;;  %v1419_v43 = vmul.f32 %v3716_v16, %v4877_v2  ;;  %v706_v0 = vadd.f32 %v4832_v15, %v636_v44 }
 0x243   : > { %v1865_v53 = vadd.f32 %v1801_v21, %v1477_v41  ;;  %v1836_v31 = vmul.f32 %v3736_v50, %v1722_v23  ;;  %2652 = vmatprep.mubr.f32.mxu0 %v1928_v37  ;;  %v1932_v61 = vmax.f32 %v1868_v42, 0.0  ;;  %v668_v5 = vmul.f32 %v4834_v47, %v4878_v1  ;;  %v4879_v41 = vld [vmem:[#allocation136_spill] sm:$0xff] }
 0x244   : > { %v1590_v54 = vpop.permute.xlu0 %1589  ;;  %v1418_v37 = vmul.f32 %v3716_v16, %v4879_v41  ;;  %v1095_v26 = vadd.f32 %v1031_v9, %v707_v11  ;;  %v1094_v4 = vadd.f32 %v1030_v58, %v706_v0  ;;  %v1062_v36 = vmul.f32 %v3707_v27, %v4880_v18  ;;  %v4889_v11 = vld [vmem:[#allocation66_spill] sm:$0xff] }
 0x245   : > { %v1929_v45 = vmax.f32 %v1865_v53, 0.0  ;;  %v1900_v52 = vadd.f32 %v1836_v31, %v1512_v38  ;;  %v1803_v59 = vmul.f32 %v3736_v50, %v1590_v54  ;;  %1777 = vperm.xlu1 %2797, %v2812_v51   ;;  %v1481_v51 = vadd.f32 %v1417_v12, %v1093_v13  ;;  %v4891_v41 = vld [vmem:[#allocation114_spill] sm:$0xff] }
 0x246   : > { %v1726_v39 = vpop.permute.xlu1 %1725  ;;  %v669_v23 = vmul.f32 %v4834_v47, %v4881_v63  ;;  %v1483_v25 = vadd.f32 %v1419_v43, %v1095_v26  ;;  %v738_v38 = vadd.f32 %v4832_v15, %v668_v5  ;;  %v1482_v53 = vadd.f32 %v1418_v37, %v1094_v4  ;;  %v4890_v43 = vld [vmem:[#allocation138_spill] sm:$0xff] }
 0x247   : > { %v1964_v3 = vmax.f32 %v1900_v52, 0.0  ;;  %v1867_v34 = vadd.f32 %v1803_v59, %v1479_v60  ;;  %v1837_v48 = vmul.f32 %v3736_v50, %v1726_v39  ;;  %2653 = vmatmul.mubr.f32.gmra.mxu0 %v1929_v45  ;;  %v4882_v60 = vld [vmem:[#allocation113_spill] sm:$0xff]  ;;  %v4883_v52 = vld [vmem:[#allocation155_spill] sm:$0xff]  ;;  %v639_v44 = vmul.f32 %v4834_v47, %v4884_v14  ;;  %v4898_v14 = vld [vmem:[#allocation90_spill] sm:$0xff] }
 0x248   : > { %2655 = vmatprep.mubr.f32.mxu0 %v1930_v22  ;;  %v1598_v10 = vpop.permute.xlu0 %1597  ;;  %v1126_v56 = vadd.f32 %v1062_v36, %v738_v38  ;;  %v1063_v54 = vmul.f32 %v3707_v27, %v4882_v60  ;;  %v739_v12 = vadd.f32 %v4832_v15, %v669_v23  ;;  %v1451_v59 = vmul.f32 %v3716_v16, %v4883_v52  ;;  %v4893_v38 = vld [vmem:[#allocation115_spill] sm:$0xff] }
 0x249   : > { %v1931_v33 = vmax.f32 %v1867_v34, 0.0  ;;  %v1901_v49 = vadd.f32 %v1837_v48, %v1513_v35  ;;  %v1805_v40 = vmul.f32 %v3736_v50, %v1598_v10  ;;  %1781 = vperm.xlu1 %2797, %v2814_v30   ;;  %2706 = vmatprep.mubr.f32.mxu1 %v1964_v3  ;;  %v4885_v10 = vld [vmem:[#allocation34_spill] sm:$0xff]  ;;  %v4887_v30 = vld [vmem:[#allocation88_spill] sm:$0xff]  ;;  %v709_v58 = vadd.f32 %v4832_v15, %v639_v44 }
 0x24a   : > { %v1127_v35 = vadd.f32 %v1063_v54, %v739_v12  ;;  %v1032_v46 = vmul.f32 %v3707_v27, %v4887_v30  ;;  %v670_v2 = vmul.f32 %v4834_v47, %v4889_v11  ;;  %v1064_v37 = vmul.f32 %v3707_v27, %v4891_v41  ;;  %v4899_v30 = vld [vmem:[#allocation2_spill] sm:$0xff] }
 0x24b   : > { %v1965_v19 = vmax.f32 %v1901_v49, 0.0  ;;  %v1869_v7 = vadd.f32 %v1805_v40, %v1481_v51  ;;  %v1342_v32 = vpop.permute.xlu1 %1341  ;;  %2656 = vmatmul.mubr.f32.gmra.mxu0 %v1931_v33  ;;  %v638_v51 = vmul.f32 %v4834_v47, %v4885_v10  ;;  %v4886_v49 = vld [vmem:[#allocation89_spill] sm:$0xff]  ;;  %v1034_v44 = vmul.f32 %v3707_v27, %v4898_v14  ;;  %v4910_v14 = vld [vmem:[#allocation144_spill] sm:$0xff] }
 0x24c   : > { %2658 = vmatprep.mubr.f32.mxu0 %v1932_v61  ;;  %v1606_v62 = vpop.permute.xlu0 %1605  ;;  %v1450_v31 = vmul.f32 %v3716_v16, %v1342_v32  ;;  %v1515_v48 = vadd.f32 %v1451_v59, %v1127_v35  ;;  %v1033_v40 = vmul.f32 %v3707_v27, %v4886_v49  ;;  %v740_v18 = vadd.f32 %v4832_v15, %v670_v2  ;;  %v4895_v35 = vld [vmem:[#allocation35_spill] sm:$0xff]  ;;  %v4204_v49 = vld [vmem:[%s4562_s2] ss:$0 sm:$0xff]  ;;  %v4902_v2 = vld [vmem:[#allocation116_spill] sm:$0xff] }
 0x24d   : > { %v1933_v21 = vmax.f32 %v1869_v7, 0.0  ;;  %2707 = vmatmul.mubr.f32.gmra.mxu1 %v1965_v19  ;;  %v1807_v28 = vmul.f32 %v3736_v50, %v1606_v62  ;;  %v4888_v19 = vld [vmem:[#allocation141_spill] sm:$0xff]  ;;  %v708_v32 = vadd.f32 %v4832_v15, %v638_v51  ;;  %v1420_v62 = vmul.f32 %v3716_v16, %v4890_v43 }
 0x24e   : > { %v1514_v13 = vadd.f32 %v1450_v31, %v1126_v56  ;;  %v1421_v7 = vmul.f32 %v3716_v16, %v4888_v19  ;;  %v1097_v0 = vadd.f32 %v1033_v40, %v709_v58  ;;  %v4894_v56 = vld [vmem:[#allocation7_spill] sm:$0xff]  ;;  %v4901_v58 = vld [vmem:[#allocation140_spill] sm:$0xff]  ;;  %v1066_v43 = vmul.f32 %v3707_v27, %v4902_v2 }
 0x24f   : > { %2659 = vmatmul.mubr.f32.gmra.mxu0 %v1933_v21  ;;  %v1871_v20 = vadd.f32 %v1807_v28, %v1483_v25  ;;  %v1096_v5 = vadd.f32 %v1032_v46, %v708_v32  ;;  %v4892_v21 = vld [vmem:[#allocation65_spill] sm:$0xff]  ;;  %v1453_v60 = vmul.f32 %v3716_v16, %v4894_v56  ;;  %v1423_v46 = vmul.f32 %v3716_v16, %v4899_v30 }
 0x250   : > { %v1602_v8 = vpop.permute.xlu1 %1601  ;;  %v1614_v9 = vpop.permute.xlu0 %1613  ;;  %v671_v26 = vmul.f32 %v4834_v47, %v4892_v21  ;;  %v1485_v28 = vadd.f32 %v1421_v7, %v1097_v0  ;;  %v1422_v19 = vmul.f32 %v3716_v16, %v4901_v58 }
 0x251   : > { %v1806_v17 = vmul.f32 %v3736_v50, %v1602_v8  ;;  %v1935_v39 = vmax.f32 %v1871_v20, 0.0  ;;  %v1809_v1 = vmul.f32 %v3736_v50, %v1614_v9  ;;  %v1484_v36 = vadd.f32 %v1420_v62, %v1096_v5  ;;  %v4903_v62 = vld [vmem:[#allocation67_spill] sm:$0xff] }
 0x252   : > { %v1128_v8 = vadd.f32 %v1064_v37, %v740_v18  ;;  %v673_v0 = vmul.f32 %v4834_v47, %v4903_v62  ;;  %v4904_v18 = vld [vmem:[#allocation117_spill] sm:$0xff] }
 0x253   : > { %v1870_v24 = vadd.f32 %v1806_v17, %v1482_v53  ;;  %v1873_v25 = vadd.f32 %v1809_v1, %v1485_v28  ;;  %v1065_v53 = vmul.f32 %v3707_v27, %v4893_v38  ;;  %v741_v17 = vadd.f32 %v4832_v15, %v671_v26 }
 0x254   : > { %v1730_v45 = vpop.permute.xlu1 %1729  ;;  %v641_v15 = vmul.f32 %v4834_v47, %v4895_v35  ;;  %v1622_v10 = vpop.permute.xlu0 %1621 }
 0x255   : > { %v1934_v22 = vmax.f32 %v1870_v24, 0.0  ;;  %v1838_v42 = vmul.f32 %v3736_v50, %v1730_v45  ;;  %v1937_v45 = vmax.f32 %v1873_v25, 0.0  ;;  %v1129_v52 = vadd.f32 %v1065_v53, %v741_v17 }
 0x256   : > { %v711_v40 = vadd.f32 %v4204_v49, %v641_v15  ;;  %v1811_v32 = vmul.f32 %v3736_v50, %v1622_v10  ;;  %v4909_v15 = vld [vmem:[#allocation92_spill] sm:$0xff] }
 0x257   : > { %v1902_v3 = vadd.f32 %v1838_v42, %v1514_v13  ;;  %2661 = vmatprep.mubr.f32.mxu0 %v1934_v22  ;;  %v1517_v22 = vadd.f32 %v1453_v60, %v1129_v52  ;;  %v4906_v52 = vld [vmem:[#allocation37_spill] sm:$0xff] }
 0x258   : > { %v1734_v34 = vpop.permute.xlu1 %1733  ;;  %2662 = vmatmul.mubr.f32.gmra.mxu0 %v1935_v39 }
 0x259   : > { %v1966_v57 = vmax.f32 %v1902_v3, 0.0  ;;  %v1839_v29 = vmul.f32 %v3736_v50, %v1734_v34  ;;  %v4896_v3 = vld [vmem:[#allocation36_spill] sm:$0xff] }
 0x25a   : > { %v640_v34 = vmul.f32 %v4834_v47, %v4896_v3  ;;  %v1036_v3 = vmul.f32 %v3707_v27, %v4909_v15  ;;  %v4921_v15 = vld [vmem:[#allocation146_spill] sm:$0xff] }
 0x25b   : > { %v1903_v33 = vadd.f32 %v1839_v29, %v1515_v48  ;;  %2709 = vmatprep.mubr.f32.mxu1 %v1966_v57  ;;  %v4897_v57 = vld [vmem:[#allocation91_spill] sm:$0xff] }
 0x25c   : > { %v1035_v29 = vmul.f32 %v3707_v27, %v4897_v57  ;;  %v710_v9 = vadd.f32 %v4204_v49, %v640_v34  ;;  %v1630_v34 = vpop.permute.xlu0 %1629 }
 0x25d   : > { %v1967_v61 = vmax.f32 %v1903_v33, 0.0  ;;  %v1350_v6 = vpop.permute.xlu1 %1349 }
 0x25e   : > { %v1452_v63 = vmul.f32 %v3716_v16, %v1350_v6  ;;  %v1099_v7 = vadd.f32 %v1035_v29, %v711_v40  ;;  %v1098_v11 = vadd.f32 %v1034_v44, %v710_v9  ;;  %v1425_v44 = vmul.f32 %v3716_v16, %v4910_v14  ;;  %v4912_v40 = vld [vmem:[#allocation142_spill] sm:$0xff] }
 0x25f   : > { %2710 = vmatmul.mubr.f32.gmra.mxu1 %v1967_v61  ;;  %v4900_v61 = vld [vmem:[#allocation68_spill] sm:$0xff]  ;;  %v1424_v30 = vmul.f32 %v3716_v16, %v4912_v40  ;;  %v1813_v9 = vmul.f32 %v3736_v50, %v1630_v34 }
 0x260   : > { %v1516_v54 = vadd.f32 %v1452_v63, %v1128_v8  ;;  %v672_v6 = vmul.f32 %v4834_v47, %v4900_v61  ;;  %v1487_v1 = vadd.f32 %v1423_v46, %v1099_v7  ;;  %v1486_v37 = vadd.f32 %v1422_v19, %v1098_v11  ;;  %v4905_v8 = vld [vmem:[#allocation13_spill] sm:$0xff] }
 0x261   : > { %v1455_v38 = vmul.f32 %v3716_v16, %v4905_v8  ;;  %v4914_v19 = vld [vmem:[#allocation69_spill] sm:$0xff] }
 0x262   : > { %v1610_v4 = vpop.permute.xlu1 %1609  ;;  %v742_v41 = vadd.f32 %v4204_v49, %v672_v6  ;;  %v1875_v28 = vadd.f32 %v1811_v32, %v1487_v1  ;;  %v4913_v6 = vld [vmem:[#allocation4_spill] sm:$0xff]  ;;  %v675_v7 = vmul.f32 %v4834_v47, %v4914_v19 }
 0x263   : > { %v1808_v23 = vmul.f32 %v3736_v50, %v1610_v4  ;;  %v1068_v58 = vmul.f32 %v3707_v27, %v4913_v6 }
 0x264   : > { %v1130_v4 = vadd.f32 %v1066_v43, %v742_v41  ;;  %v4915_v41 = vld [vmem:[#allocation118_spill] sm:$0xff] }
 0x265   : > { %v1872_v31 = vadd.f32 %v1808_v23, %v1484_v36  ;;  %v1067_v36 = vmul.f32 %v3707_v27, %v4904_v18  ;;  %v743_v23 = vadd.f32 %v4204_v49, %v673_v0 }
 0x266   : > { %v1738_v20 = vpop.permute.xlu1 %1737 }
 0x267   : > { %v1936_v24 = vmax.f32 %v1872_v31, 0.0  ;;  %v1840_v12 = vmul.f32 %v3736_v50, %v1738_v20  ;;  %v1939_v20 = vmax.f32 %v1875_v28, 0.0  ;;  %v1131_v56 = vadd.f32 %v1067_v36, %v743_v23 }
 0x269   : > { %v1904_v59 = vadd.f32 %v1840_v12, %v1516_v54  ;;  %2664 = vmatprep.mubr.f32.mxu0 %v1936_v24  ;;  %v1519_v24 = vadd.f32 %v1455_v38, %v1131_v56  ;;  %v4917_v56 = vld [vmem:[#allocation39_spill] sm:$0xff] }
 0x26a   : > { %v1742_v13 = vpop.permute.xlu1 %1741  ;;  %2665 = vmatmul.mubr.f32.gmra.mxu0 %v1937_v45 }
 0x26b   : > { %v1968_v42 = vmax.f32 %v1904_v59, 0.0  ;;  %v1841_v39 = vmul.f32 %v3736_v50, %v1742_v13  ;;  %v643_v59 = vmul.f32 %v4834_v47, %v4906_v52  ;;  %v4907_v13 = vld [vmem:[#allocation38_spill] sm:$0xff] }
 0x26d   : > { %v1905_v48 = vadd.f32 %v1841_v39, %v1517_v22  ;;  %2712 = vmatprep.mubr.f32.mxu1 %v1968_v42  ;;  %v642_v22 = vmul.f32 %v4834_v47, %v4907_v13  ;;  %v4908_v39 = vld [vmem:[#allocation93_spill] sm:$0xff]  ;;  %v713_v29 = vadd.f32 %v4204_v49, %v643_v59  ;;  %v4920_v59 = vld [vmem:[#allocation94_spill] sm:$0xff] }
 0x26e   : > { %v1037_v35 = vmul.f32 %v3707_v27, %v4908_v39  ;;  %v1038_v13 = vmul.f32 %v3707_v27, %v4920_v59  ;;  %v4932_v59 = vld [vmem:[#allocation148_spill] sm:$0xff] }
 0x26f   : > { %v1969_v51 = vmax.f32 %v1905_v48, 0.0  ;;  %v1358_v33 = vpop.permute.xlu1 %1357  ;;  %v712_v10 = vadd.f32 %v4204_v49, %v642_v22  ;;  %v1638_v22 = vpop.permute.xlu0 %1637 }
 0x270   : > { %v1454_v21 = vmul.f32 %v3716_v16, %v1358_v33  ;;  %v1101_v46 = vadd.f32 %v1037_v35, %v713_v29  ;;  %v4923_v29 = vld [vmem:[#allocation143_spill] sm:$0xff] }
 0x271   : > { %2713 = vmatmul.mubr.f32.gmra.mxu1 %v1969_v51  ;;  %v4911_v51 = vld [vmem:[#allocation70_spill] sm:$0xff]  ;;  %v1100_v61 = vadd.f32 %v1036_v3, %v712_v10  ;;  %v1427_v3 = vmul.f32 %v3716_v16, %v4921_v15  ;;  %v1426_v14 = vmul.f32 %v3716_v16, %v4923_v29  ;;  %v1815_v10 = vmul.f32 %v3736_v50, %v1638_v22 }
 0x272   : > { %v1518_v53 = vadd.f32 %v1454_v21, %v1130_v4  ;;  %v674_v33 = vmul.f32 %v4834_v47, %v4911_v51  ;;  %v1489_v32 = vadd.f32 %v1425_v44, %v1101_v46  ;;  %v4916_v4 = vld [vmem:[#allocation17_spill] sm:$0xff] }
 0x273   : > { %v1488_v43 = vadd.f32 %v1424_v30, %v1100_v61  ;;  %v1457_v18 = vmul.f32 %v3716_v16, %v4916_v4  ;;  %v4925_v30 = vld [vmem:[#allocation6_spill] sm:$0xff] }
 0x274   : > { %v1618_v5 = vpop.permute.xlu1 %1617  ;;  %v744_v2 = vadd.f32 %v4204_v49, %v674_v33  ;;  %v1877_v1 = vadd.f32 %v1813_v9, %v1489_v32  ;;  %v4924_v33 = vld [vmem:[#allocation119_spill] sm:$0xff]  ;;  %v677_v46 = vmul.f32 %v4834_v47, %v4925_v30 }
 0x275   : > { %v1810_v26 = vmul.f32 %v3736_v50, %v1618_v5  ;;  %v1070_v40 = vmul.f32 %v3707_v27, %v4924_v33 }
 0x276   : > { %v1132_v5 = vadd.f32 %v1068_v58, %v744_v2  ;;  %v4926_v2 = vld [vmem:[#allocation120_spill] sm:$0xff] }
 0x277   : > { %v1874_v63 = vadd.f32 %v1810_v26, %v1486_v37  ;;  %v1069_v37 = vmul.f32 %v3707_v27, %v4915_v41  ;;  %v745_v26 = vadd.f32 %v4204_v49, %v675_v7 }
 0x278   : > { %v1746_v25 = vpop.permute.xlu1 %1745 }
 0x279   : > { %v1938_v31 = vmax.f32 %v1874_v63, 0.0  ;;  %v1842_v17 = vmul.f32 %v3736_v50, %v1746_v25  ;;  %v1941_v25 = vmax.f32 %v1877_v1, 0.0  ;;  %v1133_v8 = vadd.f32 %v1069_v37, %v745_v26 }
 0x27b   : > { %v1906_v60 = vadd.f32 %v1842_v17, %v1518_v53  ;;  %2667 = vmatprep.mubr.f32.mxu0 %v1938_v31  ;;  %v1521_v31 = vadd.f32 %v1457_v18, %v1133_v8  ;;  %v4928_v8 = vld [vmem:[#allocation41_spill] sm:$0xff] }
 0x27c   : > { %v1750_v54 = vpop.permute.xlu1 %1749  ;;  %2668 = vmatmul.mubr.f32.gmra.mxu0 %v1939_v20 }
 0x27d   : > { %v1970_v12 = vmax.f32 %v1906_v60, 0.0  ;;  %v1843_v45 = vmul.f32 %v3736_v50, %v1750_v54  ;;  %v645_v60 = vmul.f32 %v4834_v47, %v4917_v56  ;;  %v4918_v54 = vld [vmem:[#allocation40_spill] sm:$0xff] }
 0x27f   : > { %v1907_v42 = vadd.f32 %v1843_v45, %v1519_v24  ;;  %2715 = vmatprep.mubr.f32.mxu1 %v1970_v12  ;;  %v644_v24 = vmul.f32 %v4834_v47, %v4918_v54  ;;  %v4919_v45 = vld [vmem:[#allocation95_spill] sm:$0xff]  ;;  %v715_v35 = vadd.f32 %v4204_v49, %v645_v60  ;;  %v4931_v60 = vld [vmem:[#allocation96_spill] sm:$0xff] }
 0x280   : > { %v1039_v52 = vmul.f32 %v3707_v27, %v4919_v45  ;;  %v1040_v54 = vmul.f32 %v3707_v27, %v4931_v60  ;;  %v4943_v60 = vld [vmem:[#allocation149_spill] sm:$0xff] }
 0x281   : > { %v1971_v48 = vmax.f32 %v1907_v42, 0.0  ;;  %v1366_v57 = vpop.permute.xlu1 %1365  ;;  %v714_v34 = vadd.f32 %v4204_v49, %v644_v24  ;;  %v1646_v24 = vpop.permute.xlu0 %1645 }
 0x282   : > { %v1456_v62 = vmul.f32 %v3716_v16, %v1366_v57  ;;  %v1103_v44 = vadd.f32 %v1039_v52, %v715_v35  ;;  %v4934_v35 = vld [vmem:[#allocation145_spill] sm:$0xff] }
 0x283   : > { %2716 = vmatmul.mubr.f32.gmra.mxu1 %v1971_v48  ;;  %v4922_v48 = vld [vmem:[#allocation71_spill] sm:$0xff]  ;;  %v1102_v51 = vadd.f32 %v1038_v13, %v714_v34  ;;  %v1429_v13 = vmul.f32 %v3716_v16, %v4932_v59  ;;  %v1428_v15 = vmul.f32 %v3716_v16, %v4934_v35  ;;  %v1817_v34 = vmul.f32 %v3736_v50, %v1646_v24 }
 0x284   : > { %v1520_v36 = vadd.f32 %v1456_v62, %v1132_v5  ;;  %v676_v57 = vmul.f32 %v4834_v47, %v4922_v48  ;;  %v1491_v9 = vadd.f32 %v1427_v3, %v1103_v44  ;;  %v4927_v5 = vld [vmem:[#allocation22_spill] sm:$0xff]  ;;  %v4946_v35 = vld [vmem:[#allocation123_spill] sm:$0xff] }
 0x285   : > { %v1490_v58 = vadd.f32 %v1426_v14, %v1102_v51  ;;  %v1459_v41 = vmul.f32 %v3716_v16, %v4927_v5  ;;  %v4936_v14 = vld [vmem:[#allocation9_spill] sm:$0xff] }
 0x286   : > { %v1626_v11 = vpop.permute.xlu1 %1625  ;;  %v746_v6 = vadd.f32 %v4204_v49, %v676_v57  ;;  %v1879_v32 = vadd.f32 %v1815_v10, %v1491_v9  ;;  %v4935_v57 = vld [vmem:[#allocation121_spill] sm:$0xff]  ;;  %v679_v44 = vmul.f32 %v4834_v47, %v4936_v14 }
 0x287   : > { %v1812_v0 = vmul.f32 %v3736_v50, %v1626_v11  ;;  %v1072_v29 = vmul.f32 %v3707_v27, %v4935_v57 }
 0x288   : > { %v1134_v11 = vadd.f32 %v1070_v40, %v746_v6  ;;  %v4937_v6 = vld [vmem:[#allocation122_spill] sm:$0xff] }
 0x289   : > { %v1876_v21 = vadd.f32 %v1812_v0, %v1488_v43  ;;  %v1071_v43 = vmul.f32 %v3707_v27, %v4926_v2  ;;  %v747_v0 = vadd.f32 %v4204_v49, %v677_v46 }
 0x28a   : > { %v1754_v28 = vpop.permute.xlu1 %1753 }
 0x28b   : > { %v1940_v63 = vmax.f32 %v1876_v21, 0.0  ;;  %v1844_v23 = vmul.f32 %v3736_v50, %v1754_v28  ;;  %v1943_v28 = vmax.f32 %v1879_v32, 0.0  ;;  %v1135_v4 = vadd.f32 %v1071_v43, %v747_v0 }
 0x28d   : > { %v1908_v38 = vadd.f32 %v1844_v23, %v1520_v36  ;;  %2670 = vmatprep.mubr.f32.mxu0 %v1940_v63  ;;  %v1523_v63 = vadd.f32 %v1459_v41, %v1135_v4  ;;  %v4939_v4 = vld [vmem:[#allocation43_spill] sm:$0xff] }
 0x28e   : > { %v1758_v53 = vpop.permute.xlu1 %1757  ;;  %2671 = vmatmul.mubr.f32.gmra.mxu0 %v1941_v25 }
 0x28f   : > { %v1972_v17 = vmax.f32 %v1908_v38, 0.0  ;;  %v1845_v20 = vmul.f32 %v3736_v50, %v1758_v53  ;;  %v647_v38 = vmul.f32 %v4834_v47, %v4928_v8  ;;  %v4929_v53 = vld [vmem:[#allocation42_spill] sm:$0xff] }
 0x291   : > { %v1909_v12 = vadd.f32 %v1845_v20, %v1521_v31  ;;  %2718 = vmatprep.mubr.f32.mxu1 %v1972_v17  ;;  %v646_v31 = vmul.f32 %v4834_v47, %v4929_v53  ;;  %v4930_v20 = vld [vmem:[#allocation97_spill] sm:$0xff]  ;;  %v717_v52 = vadd.f32 %v4204_v49, %v647_v38  ;;  %v4942_v38 = vld [vmem:[#allocation98_spill] sm:$0xff] }
 0x292   : > { %v1041_v56 = vmul.f32 %v3707_v27, %v4930_v20  ;;  %v1042_v53 = vmul.f32 %v3707_v27, %v4942_v38 }
 0x293   : > { %v1973_v42 = vmax.f32 %v1909_v12, 0.0  ;;  %v1374_v39 = vpop.permute.xlu1 %1373  ;;  %v716_v22 = vadd.f32 %v4204_v49, %v646_v31  ;;  %v1654_v31 = vpop.permute.xlu0 %1653 }
 0x294   : > { %v1458_v19 = vmul.f32 %v3716_v16, %v1374_v39  ;;  %v1105_v3 = vadd.f32 %v1041_v56, %v717_v52  ;;  %v4945_v52 = vld [vmem:[#allocation147_spill] sm:$0xff] }
 0x295   : > { %2719 = vmatmul.mubr.f32.gmra.mxu1 %v1973_v42  ;;  %v4933_v42 = vld [vmem:[#allocation8_spill] sm:$0xff]  ;;  %v1104_v48 = vadd.f32 %v1040_v54, %v716_v22  ;;  %v1431_v54 = vmul.f32 %v3716_v16, %v4943_v60  ;;  %v1430_v59 = vmul.f32 %v3716_v16, %v4945_v52 }
 0x296   : > { %v1522_v37 = vadd.f32 %v1458_v19, %v1134_v11  ;;  %v678_v39 = vmul.f32 %v4834_v47, %v4933_v42  ;;  %v1493_v10 = vadd.f32 %v1429_v13, %v1105_v3  ;;  %v4938_v11 = vld [vmem:[#allocation45_spill] sm:$0xff]  ;;  %v4341_v13 = vld [vmem:[%s4564_s4] ss:$0 sm:$0xff]  ;;  %v1819_v42 = vmul.f32 %v3736_v50, %v1654_v31 }
 0x297   : > { %v1492_v40 = vadd.f32 %v1428_v15, %v1104_v48  ;;  %v1461_v2 = vmul.f32 %v3716_v16, %v4938_v11  ;;  %v1074_v15 = vmul.f32 %v3707_v27, %v4946_v35 }
 0x298   : > { %v1634_v61 = vpop.permute.xlu1 %1633  ;;  %v748_v33 = vadd.f32 %v4204_v49, %v678_v39  ;;  %v1881_v9 = vadd.f32 %v1817_v34, %v1493_v10  ;;  %v4947_v34 = vld [vmem:[#allocation11_spill] sm:$0xff] }
 0x299   : > { %v1814_v7 = vmul.f32 %v3736_v50, %v1634_v61  ;;  %v681_v48 = vmul.f32 %v4834_v47, %v4947_v34 }
 0x29a   : > { %v1136_v61 = vadd.f32 %v1072_v29, %v748_v33 }
 0x29b   : > { %v1878_v62 = vadd.f32 %v1814_v7, %v1490_v58  ;;  %v1073_v58 = vmul.f32 %v3707_v27, %v4937_v6  ;;  %v749_v7 = vadd.f32 %v4204_v49, %v679_v44 }
 0x29c   : > { %v1762_v1 = vpop.permute.xlu1 %1761 }
 0x29d   : > { %v1942_v21 = vmax.f32 %v1878_v62, 0.0  ;;  %v1846_v26 = vmul.f32 %v3736_v50, %v1762_v1  ;;  %v1945_v1 = vmax.f32 %v1881_v9, 0.0  ;;  %v1137_v5 = vadd.f32 %v1073_v58, %v749_v7 }
 0x29e   : > { %v751_v58 = vadd.f32 %v4204_v49, %v681_v48  ;;  %v1463_v7 = vmul.f32 %v3716_v16, %v3902_v55 }
 0x29f   : > { %v1910_v18 = vadd.f32 %v1846_v26, %v1522_v37  ;;  %2673 = vmatprep.mubr.f32.mxu0 %v1942_v21  ;;  %v1525_v21 = vadd.f32 %v1461_v2, %v1137_v5 }
 0x2a0   : > { %v1766_v36 = vpop.permute.xlu1 %1765  ;;  %2674 = vmatmul.mubr.f32.gmra.mxu0 %v1943_v28 }
 0x2a1   : > { %v1974_v23 = vmax.f32 %v1910_v18, 0.0  ;;  %v1847_v25 = vmul.f32 %v3736_v50, %v1766_v36  ;;  %v649_v18 = vmul.f32 %v4834_v47, %v4939_v4  ;;  %v4940_v36 = vld [vmem:[#allocation44_spill] sm:$0xff] }
 0x2a3   : > { %v1911_v17 = vadd.f32 %v1847_v25, %v1523_v63  ;;  %2721 = vmatprep.mubr.f32.mxu1 %v1974_v23  ;;  %v648_v63 = vmul.f32 %v4834_v47, %v4940_v36  ;;  %v4941_v25 = vld [vmem:[#allocation99_spill] sm:$0xff]  ;;  %v719_v56 = vadd.f32 %v4204_v49, %v649_v18 }
 0x2a4   : > { %v1043_v8 = vmul.f32 %v3707_v27, %v4941_v25 }
 0x2a5   : > { %v1975_v12 = vmax.f32 %v1911_v17, 0.0  ;;  %v1382_v45 = vpop.permute.xlu1 %1381  ;;  %v718_v24 = vadd.f32 %v4204_v49, %v648_v63 }
 0x2a6   : > { %v1460_v30 = vmul.f32 %v3716_v16, %v1382_v45  ;;  %v1107_v22 = vadd.f32 %v1043_v8, %v719_v56 }
 0x2a7   : > { %2722 = vmatmul.mubr.f32.gmra.mxu1 %v1975_v12  ;;  %v4944_v12 = vld [vmem:[#allocation10_spill] sm:$0xff]  ;;  %v1106_v39 = vadd.f32 %v1042_v53, %v718_v24 }
 0x2a8   : > { %v1524_v43 = vadd.f32 %v1460_v30, %v1136_v61  ;;  %v680_v45 = vmul.f32 %v4834_v47, %v4944_v12  ;;  %v1495_v57 = vadd.f32 %v1431_v54, %v1107_v22  ;;  %v4948_v47 = vld [vmem:[#allocation124_spill] sm:$0xff] }
 0x2a9   : > { %v1494_v10 = vadd.f32 %v1430_v59, %v1106_v39  ;;  %v1075_v61 = vmul.f32 %v3707_v27, %v4948_v47 }
 0x2aa   : > { %v1642_v51 = vpop.permute.xlu1 %1641  ;;  %v750_v44 = vadd.f32 %v4204_v49, %v680_v45  ;;  %v1883_v30 = vadd.f32 %v1819_v42, %v1495_v57 }
 0x2ab   : > { %v1816_v46 = vmul.f32 %v3736_v50, %v1642_v51 }
 0x2ac   : > { %v1138_v9 = vadd.f32 %v1074_v15, %v750_v44 }
 0x2ad   : > { %v1880_v19 = vadd.f32 %v1816_v46, %v1492_v40 }
 0x2ae   : > { %v1770_v32 = vpop.permute.xlu1 %1769 }
 0x2af   : > { %v1944_v62 = vmax.f32 %v1880_v19, 0.0  ;;  %v1848_v0 = vmul.f32 %v3736_v50, %v1770_v32 }
 0x2b1   : > { %v1912_v41 = vadd.f32 %v1848_v0, %v1524_v43  ;;  %2676 = vmatprep.mubr.f32.mxu0 %v1944_v62  ;;  %v1947_v43 = vmax.f32 %v1883_v30, 0.0  ;;  %v1139_v62 = vadd.f32 %v1075_v61, %v751_v58 }
 0x2b2   : > { %v1774_v37 = vpop.permute.xlu1 %1773  ;;  %2677 = vmatmul.mubr.f32.gmra.mxu0 %v1945_v1 }
 0x2b3   : > { %v1976_v26 = vmax.f32 %v1912_v41, 0.0  ;;  %v1849_v28 = vmul.f32 %v3736_v50, %v1774_v37  ;;  %v1527_v1 = vadd.f32 %v1463_v7, %v1139_v62 }
 0x2b5   : > { %v1913_v23 = vadd.f32 %v1849_v28, %v1525_v21  ;;  %2724 = vmatprep.mubr.f32.mxu1 %v1976_v26 }
 0x2b7   : > { %v1977_v17 = vmax.f32 %v1913_v23, 0.0  ;;  %v1390_v20 = vpop.permute.xlu1 %1389 }
 0x2b8   : > { %v1462_v51 = vmul.f32 %v3716_v16, %v1390_v20 }
 0x2b9   : > { %2725 = vmatmul.mubr.f32.gmra.mxu1 %v1977_v17 }
 0x2ba   : > { %v1526_v32 = vadd.f32 %v1462_v51, %v1138_v9 }
 0x2bb   : > { %v2636_v3 = vpop.f32.mrf.mxu0 }
 0x2bc   : > { %v2075_v29 = vadd.f32 %v2636_v3, %v4341_v13  ;;  %v1650_v14 = vpop.permute.xlu1 %1649 }
 0x2bd   : > { %v1818_v33 = vmul.f32 %v3736_v50, %v1650_v14  ;;  %v2069_v40 = vpop.f32.mrf.mxu0 }
 0x2be   : > { %2390 = vst.msk [vmem:[%s4351_s23 + $0x8] sm:$0xff] %vm2388_vm0, %v2075_v29  ;;  %v2070_v46 = vadd.f32 %v4341_v13, %v2069_v40 }
 0x2bf   : > { %v1882_v6 = vadd.f32 %v1818_v33, %v1494_v10 }
 0x2c0   : > { %2389 = vst.msk [vmem:[%s4351_s23] sm:$0xff] %vm2388_vm0, %v2070_v46  ;;  %v1778_v19 = vpop.permute.xlu1 %1777 }
 0x2c1   : > { %v1946_v11 = vmax.f32 %v1882_v6, 0.0  ;;  %v1850_v2 = vmul.f32 %v3736_v50, %v1778_v19 }
 0x2c3   : > { %v1914_v0 = vadd.f32 %v1850_v2, %v1526_v32  ;;  %2679 = vmatprep.mubr.f32.mxu0 %v1946_v11 }
 0x2c4   : > { %v1782_v27 = vpop.permute.xlu1 %1781  ;;  %2680 = vmatmul.mubr.f32.gmra.mxu0 %v1947_v43 }
 0x2c5   : > { %v1978_v49 = vmax.f32 %v1914_v0, 0.0  ;;  %v1851_v5 = vmul.f32 %v3736_v50, %v1782_v27 }
 0x2c7   : > { %v1915_v41 = vadd.f32 %v1851_v5, %v1527_v1  ;;  %2727 = vmatprep.mubr.f32.mxu1 %v1978_v49 }
 0x2c9   : > { %v1979_v16 = vmax.f32 %v1915_v41, 0.0 }
 0x2cb   : > { %2728 = vmatmul.mubr.f32.gmra.mxu1 %v1979_v16 }
 0x2d8   : > { %v2684_v55 = vpop.f32.mrf.mxu1 }
 0x2d9   : > { %v2235_v37 = vadd.f32 %v2684_v55, %v4341_v13 }
 0x2da   : > { %v2229_v21 = vpop.f32.mrf.mxu1 }
 0x2db   : > { %2422 = vst.msk [vmem:[%s4351_s23 + $0x108] sm:$0xff] %vm2388_vm0, %v2235_v37  ;;  %v2230_v26 = vadd.f32 %v4341_v13, %v2229_v21 }
 0x2dc   : > { %v2687_v28 = vpop.f32.mrf.mxu1 }
 0x2dd   : > { %2421 = vst.msk [vmem:[%s4351_s23 + $0x100] sm:$0xff] %vm2388_vm0, %v2230_v26  ;;  %v2245_v50 = vadd.f32 %v2687_v28, %v4341_v13 }
 0x2de   : > { %v2239_v4 = vpop.f32.mrf.mxu1 }
 0x2df   : > { %2424 = vst.msk [vmem:[%s4351_s23 + $0x118] sm:$0xff] %vm2388_vm0, %v2245_v50  ;;  %v2240_v18 = vadd.f32 %v4341_v13, %v2239_v4  ;;  %v2639_v36 = vpop.f32.mrf.mxu0 }
 0x2e0   : > { %v2085_v63 = vadd.f32 %v2639_v36, %v4341_v13  ;;  %v2690_v23 = vpop.f32.mrf.mxu1 }
 0x2e1   : > { %2423 = vst.msk [vmem:[%s4351_s23 + $0x110] sm:$0xff] %vm2388_vm0, %v2240_v18  ;;  %v2255_v25 = vadd.f32 %v2690_v23, %v4341_v13  ;;  %v2079_v8 = vpop.f32.mrf.mxu0 }
 0x2e2   : > { %2392 = vst.msk [vmem:[%s4351_s23 + $0x18] sm:$0xff] %vm2388_vm0, %v2085_v63  ;;  %v2080_v38 = vadd.f32 %v4341_v13, %v2079_v8  ;;  %v2249_v53 = vpop.f32.mrf.mxu1 }
 0x2e3   : > { %2426 = vst.msk [vmem:[%s4351_s23 + $0x128] sm:$0xff] %vm2388_vm0, %v2255_v25  ;;  %v2250_v31 = vadd.f32 %v4341_v13, %v2249_v53 }
 0x2e4   : > { %2391 = vst.msk [vmem:[%s4351_s23 + $0x10] sm:$0xff] %vm2388_vm0, %v2080_v38  ;;  %v2693_v17 = vpop.f32.mrf.mxu1 }
 0x2e5   : > { %2425 = vst.msk [vmem:[%s4351_s23 + $0x120] sm:$0xff] %vm2388_vm0, %v2250_v31  ;;  %v2265_v20 = vadd.f32 %v2693_v17, %v4341_v13 }
 0x2e6   : > { %v2259_v56 = vpop.f32.mrf.mxu1 }
 0x2e7   : > { %2428 = vst.msk [vmem:[%s4351_s23 + $0x138] sm:$0xff] %vm2388_vm0, %v2265_v20  ;;  %v2260_v60 = vadd.f32 %v4341_v13, %v2259_v56  ;;  %v2642_v54 = vpop.f32.mrf.mxu0 }
 0x2e8   : > { %v2095_v24 = vadd.f32 %v2642_v54, %v4341_v13  ;;  %v2696_v12 = vpop.f32.mrf.mxu1 }
 0x2e9   : > { %2427 = vst.msk [vmem:[%s4351_s23 + $0x130] sm:$0xff] %vm2388_vm0, %v2260_v60  ;;  %v2275_v45 = vadd.f32 %v2696_v12, %v4341_v13  ;;  %v2089_v52 = vpop.f32.mrf.mxu0 }
 0x2ea   : > { %2394 = vst.msk [vmem:[%s4351_s23 + $0x28] sm:$0xff] %vm2388_vm0, %v2095_v24  ;;  %v2090_v59 = vadd.f32 %v4341_v13, %v2089_v52  ;;  %v2269_v22 = vpop.f32.mrf.mxu1 }
 0x2eb   : > { %2430 = vst.msk [vmem:[%s4351_s23 + $0x148] sm:$0xff] %vm2388_vm0, %v2275_v45  ;;  %v2270_v42 = vadd.f32 %v4341_v13, %v2269_v22 }
 0x2ec   : > { %2393 = vst.msk [vmem:[%s4351_s23 + $0x20] sm:$0xff] %vm2388_vm0, %v2090_v59  ;;  %v2699_v39 = vpop.f32.mrf.mxu1 }
 0x2ed   : > { %2429 = vst.msk [vmem:[%s4351_s23 + $0x140] sm:$0xff] %vm2388_vm0, %v2270_v42  ;;  %v2285_v35 = vadd.f32 %v2699_v39, %v4341_v13 }
 0x2ee   : > { %v2279_v15 = vpop.f32.mrf.mxu1 }
 0x2ef   : > { %2432 = vst.msk [vmem:[%s4351_s23 + $0x158] sm:$0xff] %vm2388_vm0, %v2285_v35  ;;  %v2280_v3 = vadd.f32 %v4341_v13, %v2279_v15  ;;  %v2645_v34 = vpop.f32.mrf.mxu0 }
 0x2f0   : > { %v2105_v48 = vadd.f32 %v2645_v34, %v4341_v13  ;;  %v2702_v57 = vpop.f32.mrf.mxu1 }
 0x2f1   : > { %2431 = vst.msk [vmem:[%s4351_s23 + $0x150] sm:$0xff] %vm2388_vm0, %v2280_v3  ;;  %v2295_v29 = vadd.f32 %v2702_v57, %v4341_v13  ;;  %v2099_v14 = vpop.f32.mrf.mxu0 }
 0x2f2   : > { %2396 = vst.msk [vmem:[%s4351_s23 + $0x38] sm:$0xff] %vm2388_vm0, %v2105_v48  ;;  %v2100_v44 = vadd.f32 %v4341_v13, %v2099_v14  ;;  %v2289_v10 = vpop.f32.mrf.mxu1 }
 0x2f3   : > { %2434 = vst.msk [vmem:[%s4351_s23 + $0x168] sm:$0xff] %vm2388_vm0, %v2295_v29  ;;  %v2290_v51 = vadd.f32 %v4341_v13, %v2289_v10 }
 0x2f4   : > { %2395 = vst.msk [vmem:[%s4351_s23 + $0x30] sm:$0xff] %vm2388_vm0, %v2100_v44 }
 0x2f5   : > { %2433 = vst.msk [vmem:[%s4351_s23 + $0x160] sm:$0xff] %vm2388_vm0, %v2290_v51 }
 0x2f7   : > { %v2648_v33 = vpop.f32.mrf.mxu0 }
 0x2f8   : > { %v2115_v40 = vadd.f32 %v2648_v33, %v4341_v13 }
 0x2f9   : > { %v2109_v30 = vpop.f32.mrf.mxu0 }
 0x2fa   : > { %2398 = vst.msk [vmem:[%s4351_s23 + $0x48] sm:$0xff] %vm2388_vm0, %v2115_v40  ;;  %v2110_v46 = vadd.f32 %v4341_v13, %v2109_v30 }
 0x2fc   : > { %2397 = vst.msk [vmem:[%s4351_s23 + $0x40] sm:$0xff] %vm2388_vm0, %v2110_v46  ;;  %v2705_v9 = vpop.f32.mrf.mxu1 }
 0x2fd   : > { %v2305_v47 = vadd.f32 %v2705_v9, %v4341_v13 }
 0x2fe   : > { %v2299_v61 = vpop.f32.mrf.mxu1 }
 0x2ff   : > { %2436 = vst.msk [vmem:[%s4351_s23 + $0x178] sm:$0xff] %vm2388_vm0, %v2305_v47  ;;  %v2300_v6 = vadd.f32 %v4341_v13, %v2299_v61  ;;  %v2651_v58 = vpop.f32.mrf.mxu0 }
 0x300   : > { %v2125_v19 = vadd.f32 %v2651_v58, %v4341_v13 }
 0x301   : > { %2435 = vst.msk [vmem:[%s4351_s23 + $0x170] sm:$0xff] %vm2388_vm0, %v2300_v6  ;;  %v2119_v7 = vpop.f32.mrf.mxu0 }
 0x302   : > { %2400 = vst.msk [vmem:[%s4351_s23 + $0x58] sm:$0xff] %vm2388_vm0, %v2125_v19  ;;  %v2120_v32 = vadd.f32 %v4341_v13, %v2119_v7 }
 0x304   : > { %2399 = vst.msk [vmem:[%s4351_s23 + $0x50] sm:$0xff] %vm2388_vm0, %v2120_v32 }
 0x307   : > { %v2654_v11 = vpop.f32.mrf.mxu0 }
 0x308   : > { %v2135_v2 = vadd.f32 %v2654_v11, %v4341_v13 }
 0x309   : > { %v2129_v43 = vpop.f32.mrf.mxu0 }
 0x30a   : > { %2402 = vst.msk [vmem:[%s4351_s23 + $0x68] sm:$0xff] %vm2388_vm0, %v2135_v2  ;;  %v2130_v62 = vadd.f32 %v4341_v13, %v2129_v43 }
 0x30b   : > { %v2657_v0 = vpop.f32.mrf.mxu0 }
 0x30c   : > { %2401 = vst.msk [vmem:[%s4351_s23 + $0x60] sm:$0xff] %vm2388_vm0, %v2130_v62  ;;  %v2145_v27 = vadd.f32 %v2657_v0, %v4341_v13 }
 0x30d   : > { %v2139_v1 = vpop.f32.mrf.mxu0  ;;  %v2708_v49 = vpop.f32.mrf.mxu1 }
 0x30e   : > { %2404 = vst.msk [vmem:[%s4351_s23 + $0x78] sm:$0xff] %vm2388_vm0, %v2145_v27  ;;  %v2140_v5 = vadd.f32 %v4341_v13, %v2139_v1  ;;  %v2315_v41 = vadd.f32 %v2708_v49, %v4341_v13 }
 0x30f   : > { %v2660_v16 = vpop.f32.mrf.mxu0  ;;  %v2309_v55 = vpop.f32.mrf.mxu1 }
 0x310   : > { %2403 = vst.msk [vmem:[%s4351_s23 + $0x70] sm:$0xff] %vm2388_vm0, %v2140_v5  ;;  %2438 = vst.msk [vmem:[%s4351_s23 + $0x188] sm:$0xff] %vm2388_vm0, %v2315_v41  ;;  %v2155_v37 = vadd.f32 %v2660_v16, %v4341_v13  ;;  %v2310_v21 = vadd.f32 %v4341_v13, %v2309_v55 }
 0x311   : > { %v2149_v26 = vpop.f32.mrf.mxu0 }
 0x312   : > { %2406 = vst.msk [vmem:[%s4351_s23 + $0x88] sm:$0xff] %vm2388_vm0, %v2155_v37  ;;  %2437 = vst.msk [vmem:[%s4351_s23 + $0x180] sm:$0xff] %vm2388_vm0, %v2310_v21  ;;  %v2150_v28 = vadd.f32 %v4341_v13, %v2149_v26 }
 0x314   : > { %2405 = vst.msk [vmem:[%s4351_s23 + $0x80] sm:$0xff] %vm2388_vm0, %v2150_v28 }
 0x318   : > { %v2663_v50 = vpop.f32.mrf.mxu0 }
 0x319   : > { %v2165_v4 = vadd.f32 %v2663_v50, %v4341_v13 }
 0x31a   : > { %v2159_v18 = vpop.f32.mrf.mxu0 }
 0x31b   : > { %2408 = vst.msk [vmem:[%s4351_s23 + $0x98] sm:$0xff] %vm2388_vm0, %v2165_v4  ;;  %v2160_v36 = vadd.f32 %v4341_v13, %v2159_v18 }
 0x31d   : > { %2407 = vst.msk [vmem:[%s4351_s23 + $0x90] sm:$0xff] %vm2388_vm0, %v2160_v36 }
 0x31f   : > { %v2711_v63 = vpop.f32.mrf.mxu1 }
 0x320   : > { %v2325_v23 = vadd.f32 %v2711_v63, %v4341_v13 }
 0x321   : > { %v2319_v25 = vpop.f32.mrf.mxu1 }
 0x322   : > { %2440 = vst.msk [vmem:[%s4351_s23 + $0x198] sm:$0xff] %vm2388_vm0, %v2325_v23  ;;  %v2320_v8 = vadd.f32 %v4341_v13, %v2319_v25 }
 0x324   : > { %2439 = vst.msk [vmem:[%s4351_s23 + $0x190] sm:$0xff] %vm2388_vm0, %v2320_v8 }
 0x32a   : > { %v2666_v38 = vpop.f32.mrf.mxu0 }
 0x32b   : > { %v2175_v53 = vadd.f32 %v2666_v38, %v4341_v13 }
 0x32c   : > { %v2169_v31 = vpop.f32.mrf.mxu0 }
 0x32d   : > { %2410 = vst.msk [vmem:[%s4351_s23 + $0xa8] sm:$0xff] %vm2388_vm0, %v2175_v53  ;;  %v2170_v17 = vadd.f32 %v4341_v13, %v2169_v31 }
 0x32f   : > { %2409 = vst.msk [vmem:[%s4351_s23 + $0xa0] sm:$0xff] %vm2388_vm0, %v2170_v17 }
 0x331   : > { %v2714_v20 = vpop.f32.mrf.mxu1 }
 0x332   : > { %v2335_v56 = vadd.f32 %v2714_v20, %v4341_v13 }
 0x333   : > { %v2329_v60 = vpop.f32.mrf.mxu1 }
 0x334   : > { %2442 = vst.msk [vmem:[%s4351_s23 + $0x1a8] sm:$0xff] %vm2388_vm0, %v2335_v56  ;;  %v2330_v54 = vadd.f32 %v4341_v13, %v2329_v60 }
 0x336   : > { %2441 = vst.msk [vmem:[%s4351_s23 + $0x1a0] sm:$0xff] %vm2388_vm0, %v2330_v54 }
 0x33c   : > { %v2669_v24 = vpop.f32.mrf.mxu0 }
 0x33d   : > { %v2185_v12 = vadd.f32 %v2669_v24, %v4341_v13 }
 0x33e   : > { %v2179_v45 = vpop.f32.mrf.mxu0 }
 0x33f   : > { %2412 = vst.msk [vmem:[%s4351_s23 + $0xb8] sm:$0xff] %vm2388_vm0, %v2185_v12  ;;  %v2180_v52 = vadd.f32 %v4341_v13, %v2179_v45 }
 0x341   : > { %2411 = vst.msk [vmem:[%s4351_s23 + $0xb0] sm:$0xff] %vm2388_vm0, %v2180_v52 }
 0x343   : > { %v2717_v59 = vpop.f32.mrf.mxu1 }
 0x344   : > { %v2345_v22 = vadd.f32 %v2717_v59, %v4341_v13 }
 0x345   : > { %v2339_v42 = vpop.f32.mrf.mxu1 }
 0x346   : > { %2444 = vst.msk [vmem:[%s4351_s23 + $0x1b8] sm:$0xff] %vm2388_vm0, %v2345_v22  ;;  %v2340_v39 = vadd.f32 %v4341_v13, %v2339_v42 }
 0x348   : > { %2443 = vst.msk [vmem:[%s4351_s23 + $0x1b0] sm:$0xff] %vm2388_vm0, %v2340_v39 }
 0x34e   : > { %v2672_v35 = vpop.f32.mrf.mxu0 }
 0x34f   : > { %v2195_v15 = vadd.f32 %v2672_v35, %v4341_v13 }
 0x350   : > { %v2189_v3 = vpop.f32.mrf.mxu0 }
 0x351   : > { %2414 = vst.msk [vmem:[%s4351_s23 + $0xc8] sm:$0xff] %vm2388_vm0, %v2195_v15  ;;  %v2190_v34 = vadd.f32 %v4341_v13, %v2189_v3 }
 0x353   : > { %2413 = vst.msk [vmem:[%s4351_s23 + $0xc0] sm:$0xff] %vm2388_vm0, %v2190_v34 }
 0x355   : > { %v2720_v48 = vpop.f32.mrf.mxu1 }
 0x356   : > { %v2355_v57 = vadd.f32 %v2720_v48, %v4341_v13 }
 0x357   : > { %v2349_v29 = vpop.f32.mrf.mxu1 }
 0x358   : > { %2446 = vst.msk [vmem:[%s4351_s23 + $0x1c8] sm:$0xff] %vm2388_vm0, %v2355_v57  ;;  %v2350_v14 = vadd.f32 %v4341_v13, %v2349_v29 }
 0x35a   : > { %2445 = vst.msk [vmem:[%s4351_s23 + $0x1c0] sm:$0xff] %vm2388_vm0, %v2350_v14 }
 0x360   : > { %v2675_v44 = vpop.f32.mrf.mxu0 }
 0x361   : > { %v2205_v10 = vadd.f32 %v2675_v44, %v4341_v13 }
 0x362   : > { %v2199_v51 = vpop.f32.mrf.mxu0 }
 0x363   : > { %2416 = vst.msk [vmem:[%s4351_s23 + $0xd8] sm:$0xff] %vm2388_vm0, %v2205_v10  ;;  %v2200_v33 = vadd.f32 %v4341_v13, %v2199_v51 }
 0x365   : > { %2415 = vst.msk [vmem:[%s4351_s23 + $0xd0] sm:$0xff] %vm2388_vm0, %v2200_v33 }
 0x367   : > { %v2723_v40 = vpop.f32.mrf.mxu1 }
 0x368   : > { %v2365_v30 = vadd.f32 %v2723_v40, %v4341_v13 }
 0x369   : > { %v2359_v46 = vpop.f32.mrf.mxu1 }
 0x36a   : > { %2448 = vst.msk [vmem:[%s4351_s23 + $0x1d8] sm:$0xff] %vm2388_vm0, %v2365_v30  ;;  %v2360_v9 = vadd.f32 %v4341_v13, %v2359_v46 }
 0x36c   : > { %2447 = vst.msk [vmem:[%s4351_s23 + $0x1d0] sm:$0xff] %vm2388_vm0, %v2360_v9 }
 0x372   : > { %v2678_v47 = vpop.f32.mrf.mxu0 }
 0x373   : > { %v2215_v61 = vadd.f32 %v2678_v47, %v4341_v13 }
 0x374   : > { %v2209_v6 = vpop.f32.mrf.mxu0 }
 0x375   : > { %2418 = vst.msk [vmem:[%s4351_s23 + $0xe8] sm:$0xff] %vm2388_vm0, %v2215_v61  ;;  %v2210_v58 = vadd.f32 %v4341_v13, %v2209_v6 }
 0x377   : > { %2417 = vst.msk [vmem:[%s4351_s23 + $0xe0] sm:$0xff] %vm2388_vm0, %v2210_v58 }
 0x379   : > { %v2726_v19 = vpop.f32.mrf.mxu1 }
 0x37a   : > { %v2375_v7 = vadd.f32 %v2726_v19, %v4341_v13 }
 0x37b   : > { %v2369_v32 = vpop.f32.mrf.mxu1 }
 0x37c   : > { %2450 = vst.msk [vmem:[%s4351_s23 + $0x1e8] sm:$0xff] %vm2388_vm0, %v2375_v7  ;;  %v2370_v11 = vadd.f32 %v4341_v13, %v2369_v32 }
 0x37e   : > { %2449 = vst.msk [vmem:[%s4351_s23 + $0x1e0] sm:$0xff] %vm2388_vm0, %v2370_v11 }
 0x384   : > { %v2681_v2 = vpop.f32.mrf.mxu0 }
 0x385   : > { %v2225_v43 = vadd.f32 %v2681_v2, %v4341_v13 }
 0x386   : > { %v2219_v62 = vpop.f32.mrf.mxu0 }
 0x387   : > { %2420 = vst.msk [vmem:[%s4351_s23 + $0xf8] sm:$0xff] %vm2388_vm0, %v2225_v43  ;;  %v2220_v0 = vadd.f32 %v4341_v13, %v2219_v62 }
 0x389   : > { %2419 = vst.msk [vmem:[%s4351_s23 + $0xf0] sm:$0xff] %vm2388_vm0, %v2220_v0 }
 0x38b   : > { %v2729_v27 = vpop.f32.mrf.mxu1 }
 0x38c   : > { %v2385_v1 = vadd.f32 %v2729_v27, %v4341_v13 }
 0x38d   : > { %v2379_v49 = vpop.f32.mrf.mxu1 }
 0x38e   : > { %2452 = vst.msk [vmem:[%s4351_s23 + $0x1f8] sm:$0xff] %vm2388_vm0, %v2385_v1  ;;  %v2380_v5 = vadd.f32 %v4341_v13, %v2379_v49 }
 0x390   : > { %2451 = vst.msk [vmem:[%s4351_s23 + $0x1f0] sm:$0xff] %vm2388_vm0, %v2380_v5 }
 0x391 PF: > { %s15_s18 = sadd.s32 1, %s2822_s18  }
 0x392   : > { %p12_p4 = scmp.ge.s32.totalorder %s15_s18, 4  }
 0x394   :  { %14 = sbr.rel (!%p12_p4) target bundleno = 1 (0x1), region = 70 }

</bundles_post_ra>
